<compile_context>
chip_gen: v7x
topology: tpu7x:2x2x1
jax: 0.10.0
libtpu: 0.0.40
codegen_flags: <defaults>
</compile_context>

<pallas_src>
import functools
import numpy as np
import jax
import jax.numpy as jnp
from jax.experimental import pallas as pl
from jax.experimental.pallas import tpu as pltpu


# ---------------------------------------------------------------------------
# Fused Pallas kernel: o = act(a @ b + bias)
# ---------------------------------------------------------------------------
def _leaky_relu(x, slope=0.01):
    return jnp.where(x >= 0, x, slope * x)


def _identity(x):
    return x


def _fused_mm_kernel(a_ref, b_ref, bias_ref, o_ref, *, act):
    y = jnp.dot(a_ref[...], b_ref[...], preferred_element_type=jnp.float32)
    y = y + bias_ref[...].astype(jnp.float32)
    o_ref[...] = act(y).astype(o_ref.dtype)


def _pick_tile(m, target=512):
    """Largest lane tile <= target that divides m (multiple of 128), else full m."""
    if m <= target:
        return m
    for t in (512, 384, 256, 128):
        if m % t == 0:
            return t
    return m


def fused_matmul(a, b, bias, *, act, out_dtype, bias_tiled):
    """a: (N0, K) stationary operand, b: (K, M) tiled along lanes.

    Returns act(a @ b + bias) of shape (N0, M).  M is tiled along a 'parallel'
    grid axis so VMEM stays bounded for large batches (v7x: 64 MiB) and the
    grid can be sharded across TensorCores.
    """
    N0, K = a.shape
    M = b.shape[1]
    tm = _pick_tile(M)
    if bias_tiled:                       # bias shape (1, M): broadcast over rows
        bias_spec = pl.BlockSpec((bias.shape[0], tm), lambda j: (0, j))
    else:                                # bias shape (N0, 1): broadcast over lanes
        bias_spec = pl.BlockSpec(bias.shape, lambda j: (0, 0))
    return pl.pallas_call(
        functools.partial(_fused_mm_kernel, act=act),
        out_shape=jax.ShapeDtypeStruct((N0, M), out_dtype),
        grid=(M // tm,),
        in_specs=[
            pl.BlockSpec((N0, K), lambda j: (0, 0)),
            pl.BlockSpec((K, tm), lambda j: (0, j)),
            bias_spec,
        ],
        out_specs=pl.BlockSpec((N0, tm), lambda j: (0, j)),
        compiler_params=pltpu.CompilerParams(
            dimension_semantics=("parallel",),
            vmem_limit_bytes=48 * 1024 * 1024,
        ),
    )(a, b, bias)


# ---------------------------------------------------------------------------
# ConvTranspose2d(k=4, s=2, p=1) as a single lane-dense matmul
# ---------------------------------------------------------------------------
def _build_patchesT(x_nchw):
    """x: (B, C, H, W) -> (9*C, B*H*W) bf16 (3x3 taps of the 1-padded input)."""
    # TODO(synk): patch construction + interleave still materialize in HBM via
    # XLA; a parity-separated inter-layer layout / in-kernel im2col would cut
    # that traffic further but needs layout-risky in-kernel reshapes.
    x = x_nchw.astype(jnp.bfloat16)
    B, C, H, W = x.shape
    xp = jnp.pad(x, ((0, 0), (0, 0), (1, 1), (1, 1)))
    taps = []
    for ty in range(3):
        for tx in range(3):
            taps.append(xp[:, :, ty:ty + H, tx:tx + W])   # (B, C, H, W)
    t = jnp.stack(taps, axis=0)                           # (9, B, C, H, W)
    t = jnp.transpose(t, (0, 2, 1, 3, 4))                 # (9, C, B, H, W)
    return t.reshape(9 * C, B * H * W)


def deconv4s2p1(x_nchw, w_t, bias, act, out_dtype):
    """Fused ConvTranspose2d(Cin,Cout,4,2,1) + folded affine + activation."""
    B, _, H, W = x_nchw.shape
    Cout = w_t.shape[0] // 4
    patches = _build_patchesT(x_nchw)                     # (9*Cin, B*H*W)
    out = fused_matmul(w_t, patches, bias, act=act,
                       out_dtype=out_dtype, bias_tiled=False)   # (4*Cout, B*H*W)
    o = out.reshape(2, 2, Cout, B, H, W)
    o = jnp.transpose(o, (3, 2, 4, 0, 5, 1)).reshape(B, Cout, 2 * H, 2 * W)
    return o


def linear(x, w, bias, out_dtype=jnp.bfloat16):
    """x: (B, K) @ w: (K, N) + bias. Batch padded up to a full sublane (>=8)."""
    B, K = x.shape
    Mp = max(8, ((B + 7) // 8) * 8)
    xp = jnp.zeros((Mp, K), jnp.bfloat16).at[:B].set(x.astype(jnp.bfloat16))
    out = fused_matmul(xp, w, bias, act=_identity,
                       out_dtype=out_dtype, bias_tiled=True)    # (Mp, N)
    return out[:B]


# ---------------------------------------------------------------------------
# Parameters (deterministic, synthetic) and folded eval-mode kernel params
# ---------------------------------------------------------------------------
def init_params(key, n):
    """PyTorch-layout f32 parameters (used both for folding and the reference)."""
    xlog = int(np.log2(n) - 4)
    C0 = 2 ** (3 + xlog)
    nout = 2 ** (9 + xlog)
    num_layers = int(np.log2(C0) - 3)
    kit = iter(jax.random.split(key, 64))

    def norm(shape, s=0.05):
        return s * jax.random.normal(next(kit), shape, jnp.float32)

    raw = {"W1": norm((200, nout)), "b1": norm((nout,)), "main": [], "final": {}}
    c = C0
    for _ in range(num_layers):
        co = c // 2
        raw["main"].append({
            "W": norm((c, co, 4, 4)),
            "b": norm((co,)),
            "gamma": 1.0 + norm((co,), 0.1),
            "beta": norm((co,), 0.1),
            "mean": norm((co,), 0.1),
            "var": 1.0 + 0.5 * jax.random.uniform(next(kit), (co,), jnp.float32),
        })
        c = co
    raw["final"] = {"W": norm((8, 3, 4, 4)), "b": norm((3,))}
    return raw


def _deconvT_weight(W, scale=None):
    """(Cin, Cout, 4, 4) ConvTranspose2d weight -> (4*Cout, 9*Cin) bf16.

    Row index = (a*2 + b)*Cout + co   (output-pixel parity (a, b), channel co)
    Col index = (ty*3 + tx)*Cin + c   (3x3 tap of 1-padded input, channel c)
    Optional per-channel BN scale is folded into the rows (f32, then bf16 cast).
    """
    Wn = np.asarray(W, np.float32)
    Cin, Cout = Wn.shape[:2]
    big = np.zeros((2, 2, Cout, 3, 3, Cin), np.float32)
    for a in range(2):
        for b in range(2):
            for dy in range(2):
                for dx in range(2):
                    ty, tx = a + dy, b + dx
                    ky, kx = 3 - a - 2 * dy, 3 - b - 2 * dx
                    big[a, b, :, ty, tx, :] = Wn[:, :, ky, kx].T
    if scale is not None:
        big *= np.asarray(scale, np.float32)[None, None, :, None, None, None]
    return jnp.asarray(big.reshape(4 * Cout, 9 * Cin), jnp.bfloat16)


def fold_params(raw, eps=1e-5):
    """Fold BatchNorm (eval, running stats) and precompute kernel-ready layouts."""
    params = {
        "W1": raw["W1"].astype(jnp.bfloat16),
        "b1": jnp.asarray(np.asarray(raw["b1"], np.float32).reshape(1, -1)),
        "main": [],
    }
    for L in raw["main"]:
        s = np.asarray(L["gamma"], np.float32) / np.sqrt(np.asarray(L["var"], np.float32) + eps)
        beff = (np.asarray(L["b"], np.float32) - np.asarray(L["mean"], np.float32)) * s \
            + np.asarray(L["beta"], np.float32)
        wt = _deconvT_weight(L["W"], scale=s)
        bias = jnp.asarray(np.tile(beff, 4).reshape(-1, 1))      # (4*Cout, 1) f32
        params["main"].append((wt, bias))
    wf = _deconvT_weight(raw["final"]["W"])
    bf = jnp.asarray(np.tile(np.asarray(raw["final"]["b"], np.float32), 4).reshape(-1, 1))
    params["final"] = (wf, bf)
    return params


# ---------------------------------------------------------------------------
# Decoder forward (Pallas) — jit the whole thing
# ---------------------------------------------------------------------------
def decoder_forward(params, vector, *, n):
    xlog = int(np.log2(n) - 4)
    C0 = 2 ** (3 + xlog)
    B = vector.shape[0]
    h = linear(vector, params["W1"], params["b1"])        # (B, C0*64) bf16
    h = h.reshape(B, C0, 8, 8)                            # NCHW, like torch .view
    for (wt, bias) in params["main"]:
        h = deconv4s2p1(h, wt, bias, _leaky_relu, jnp.bfloat16)
        # TODO(synk): nn.Dropout2d(p=0.25) is stochastic; eval-mode identity used.
    wt, bias = params["final"]
    h = deconv4s2p1(h, wt, bias, jax.nn.sigmoid, jnp.float32)
    return h                                              # (B, 3, H, W) NCHW


# ---------------------------------------------------------------------------
# Pure-JAX f32 reference (for correctness check)
# ---------------------------------------------------------------------------
def _ref_deconv(x, W, b):
    Wf = jnp.flip(W, (2, 3)).transpose(1, 0, 2, 3)        # (Cout, Cin, 4, 4)
    y = jax.lax.conv_general_dilated(
        x, Wf, window_strides=(1, 1), padding=((2, 2), (2, 2)),
        lhs_dilation=(2, 2), dimension_numbers=("NCHW", "OIHW", "NCHW"),
        precision=jax.lax.Precision.HIGHEST)
    return y + b[None, :, None, None]


def ref_forward(raw, vector, n, eps=1e-5):
    xlog = int(np.log2(n) - 4)
    C0 = 2 ** (3 + xlog)
    h = jnp.dot(vector, raw["W1"], precision=jax.lax.Precision.HIGHEST) + raw["b1"]
    h = h.reshape(-1, C0, 8, 8)
    for L in raw["main"]:
        h = _ref_deconv(h, L["W"], L["b"])
        inv = 1.0 / jnp.sqrt(L["var"] + eps)
        h = (h - L["mean"][None, :, None, None]) * inv[None, :, None, None]
        h = h * L["gamma"][None, :, None, None] + L["beta"][None, :, None, None]
        h = _leaky_relu(h)
    h = _ref_deconv(h, raw["final"]["W"], raw["final"]["b"])
    return jax.nn.sigmoid(h)


if __name__ == "__main__":
    n = 64      # Decoder(64): Linear(200,2048) -> (B,32,8,8) -> 3 deconvs -> (B,3,64,64)
    B = 2
    key = jax.random.PRNGKey(0)
    kp, kx = jax.random.split(key)
    raw = init_params(kp, n)
    params = fold_params(raw)
    vector = jax.random.normal(kx, (B, 200), jnp.float32)

    fwd = jax.jit(functools.partial(decoder_forward, n=n))
    out = jax.block_until_ready(fwd(params, vector))
    assert out.shape == (B, 3, 64, 64), out.shape

    ref = jax.block_until_ready(ref_forward(raw, vector, n))
    # bf16 MXU operands (f32 accumulation) vs. f32 reference: relaxed tolerance.
    np.testing.assert_allclose(np.asarray(out, np.float32), np.asarray(ref),
                               atol=1e-2, rtol=1e-2)
    print("KERNEL_OK")
</pallas_src>

<mosaic_0001>
module attributes {stable_mosaic.version = 11 : i64} {
  func.func @_fused_mm_kernel(%arg0: i32, %arg1: memref<8x200xbf16, #tpu.memory_space<vmem>>, %arg2: memref<200x512xbf16, #tpu.memory_space<vmem>>, %arg3: memref<1x512xf32, #tpu.memory_space<vmem>>, %arg4: memref<8x512xbf16, #tpu.memory_space<vmem>>) attributes {dimension_semantics = [#tpu.dimension_semantics<parallel>], iteration_bounds = array<i64: 4>, scalar_prefetch = 0 : i64, scratch_operands = 0 : i64, tpu.core_type = #tpu.core_type<tc>, window_params = [{pipeline_mode = #tpu.pipeline_mode<synchronous>, transform_indices = @transform_0, window_bounds = array<i64: 8, 200>}, {transform_indices = @transform_1, window_bounds = array<i64: 200, 512>}, {transform_indices = @transform_2, window_bounds = array<i64: 1, 512>}, {transform_indices = @transform_3, window_bounds = array<i64: 8, 512>}]} {
    %c0 = arith.constant 0 : index
    %c0_0 = arith.constant 0 : index
    %0 = vector.load %arg1[%c0, %c0_0] : memref<8x200xbf16, #tpu.memory_space<vmem>>, vector<8x200xbf16>
    %c0_1 = arith.constant 0 : index
    %c0_2 = arith.constant 0 : index
    %1 = vector.load %arg2[%c0_1, %c0_2] : memref<200x512xbf16, #tpu.memory_space<vmem>>, vector<200x512xbf16>
    %cst = arith.constant dense<0.000000e+00> : vector<8x512xf32>
    %2 = tpu.matmul %0, %1, %cst {dimension_numbers = #tpu.dot_dimension_numbers<[1], [0], [0], [1], [0, 0, 1, 1], [], []>} : vector<8x200xbf16>, vector<200x512xbf16>, vector<8x512xf32> -> vector<8x512xf32>
    %c0_3 = arith.constant 0 : index
    %c0_4 = arith.constant 0 : index
    %3 = vector.load %arg3[%c0_3, %c0_4] : memref<1x512xf32, #tpu.memory_space<vmem>>, vector<1x512xf32>
    %4 = vector.broadcast %3 : vector<1x512xf32> to vector<8x512xf32>
    %5 = arith.addf %2, %4 : vector<8x512xf32>
    %6 = arith.truncf %5 : vector<8x512xf32> to vector<8x512xbf16>
    %c0_5 = arith.constant 0 : index
    %c0_6 = arith.constant 0 : index
    %7 = vector.load %arg4[%c0_5, %c0_6] : memref<8x512xbf16, #tpu.memory_space<vmem>>, vector<8x512xbf16>
    tpu.vector_store %arg4[%c0_5, %c0_6], %6 {strides = array<i32>} : memref<8x512xbf16, #tpu.memory_space<vmem>>, vector<8x512xbf16>,
    return
  }
  func.func @transform_0(%arg0: i32) -> (i32, i32) {
    %c0_i32 = arith.constant 0 : i32
    %c0_i32_0 = arith.constant 0 : i32
    %c0_i32_1 = arith.constant 0 : i32
    return %c0_i32, %c0_i32_0 : i32, i32
  }
  func.func @transform_1(%arg0: i32) -> (i32, i32) {
    %c0_i32 = arith.constant 0 : i32
    %c0_i32_0 = arith.constant 0 : i32
    return %c0_i32, %arg0 : i32, i32
  }
  func.func @transform_2(%arg0: i32) -> (i32, i32) {
    %c0_i32 = arith.constant 0 : i32
    %c0_i32_0 = arith.constant 0 : i32
    return %c0_i32, %arg0 : i32, i32
  }
  func.func @transform_3(%arg0: i32) -> (i32, i32) {
    %c0_i32 = arith.constant 0 : i32
    %c0_i32_0 = arith.constant 0 : i32
    return %c0_i32, %arg0 : i32, i32
  }
}

module attributes {stable_mosaic.version = 11 : i64} {
  func.func @_fused_mm_kernel(%arg0: i32, %arg1: memref<64x288xbf16, #tpu.memory_space<vmem>>, %arg2: memref<288x128xbf16, #tpu.memory_space<vmem>>, %arg3: memref<64x1xf32, #tpu.memory_space<vmem>>, %arg4: memref<64x128xbf16, #tpu.memory_space<vmem>>) attributes {dimension_semantics = [#tpu.dimension_semantics<parallel>], iteration_bounds = array<i64: 1>, scalar_prefetch = 0 : i64, scratch_operands = 0 : i64, tpu.core_type = #tpu.core_type<tc>, window_params = [{pipeline_mode = #tpu.pipeline_mode<synchronous>, transform_indices = @transform_0, window_bounds = array<i64: 64, 288>}, {transform_indices = @transform_1, window_bounds = array<i64: 288, 128>}, {pipeline_mode = #tpu.pipeline_mode<synchronous>, transform_indices = @transform_2, window_bounds = array<i64: 64, 1>}, {transform_indices = @transform_3, window_bounds = array<i64: 64, 128>}]} {
    %c0 = arith.constant 0 : index
    %c0_0 = arith.constant 0 : index
    %0 = vector.load %arg1[%c0, %c0_0] : memref<64x288xbf16, #tpu.memory_space<vmem>>, vector<64x288xbf16>
    %c0_1 = arith.constant 0 : index
    %c0_2 = arith.constant 0 : index
    %1 = vector.load %arg2[%c0_1, %c0_2] : memref<288x128xbf16, #tpu.memory_space<vmem>>, vector<288x128xbf16>
    %cst = arith.constant dense<0.000000e+00> : vector<64x128xf32>
    %2 = tpu.matmul %0, %1, %cst {dimension_numbers = #tpu.dot_dimension_numbers<[1], [0], [0], [1], [0, 0, 1, 1], [], []>} : vector<64x288xbf16>, vector<288x128xbf16>, vector<64x128xf32> -> vector<64x128xf32>
    %c0_3 = arith.constant 0 : index
    %c0_4 = arith.constant 0 : index
    %3 = vector.load %arg3[%c0_3, %c0_4] : memref<64x1xf32, #tpu.memory_space<vmem>>, vector<64x1xf32>
    %4 = vector.broadcast %3 : vector<64x1xf32> to vector<64x128xf32>
    %5 = arith.addf %2, %4 : vector<64x128xf32>
    %cst_5 = arith.constant 0.000000e+00 : f32
    %6 = vector.broadcast %cst_5 : f32 to vector<64x128xf32>
    %7 = arith.cmpf oge, %5, %6 : vector<64x128xf32>
    %cst_6 = arith.constant 0.00999999977 : f32
    %8 = vector.broadcast %cst_6 : f32 to vector<64x128xf32>
    %9 = arith.mulf %8, %5 : vector<64x128xf32>
    %10 = arith.select %7, %5, %9 : vector<64x128xi1>, vector<64x128xf32>
    %11 = arith.truncf %10 : vector<64x128xf32> to vector<64x128xbf16>
    %c0_7 = arith.constant 0 : index
    %c0_8 = arith.constant 0 : index
    %12 = vector.load %arg4[%c0_7, %c0_8] : memref<64x128xbf16, #tpu.memory_space<vmem>>, vector<64x128xbf16>
    tpu.vector_store %arg4[%c0_7, %c0_8], %11 {strides = array<i32>} : memref<64x128xbf16, #tpu.memory_space<vmem>>, vector<64x128xbf16>,
    return
  }
  func.func @transform_0(%arg0: i32) -> (i32, i32) {
    %c0_i32 = arith.constant 0 : i32
    %c0_i32_0 = arith.constant 0 : i32
    %c0_i32_1 = arith.constant 0 : i32
    return %c0_i32, %c0_i32_0 : i32, i32
  }
  func.func @transform_1(%arg0: i32) -> (i32, i32) {
    %c0_i32 = arith.constant 0 : i32
    %c0_i32_0 = arith.constant 0 : i32
    return %c0_i32, %arg0 : i32, i32
  }
  func.func @transform_2(%arg0: i32) -> (i32, i32) {
    %c0_i32 = arith.constant 0 : i32
    %c0_i32_0 = arith.constant 0 : i32
    %c0_i32_1 = arith.constant 0 : i32
    return %c0_i32, %c0_i32_0 : i32, i32
  }
  func.func @transform_3(%arg0: i32) -> (i32, i32) {
    %c0_i32 = arith.constant 0 : i32
    %c0_i32_0 = arith.constant 0 : i32
    return %c0_i32, %arg0 : i32, i32
  }
}

module attributes {stable_mosaic.version = 11 : i64} {
  func.func @_fused_mm_kernel(%arg0: i32, %arg1: memref<32x144xbf16, #tpu.memory_space<vmem>>, %arg2: memref<144x512xbf16, #tpu.memory_space<vmem>>, %arg3: memref<32x1xf32, #tpu.memory_space<vmem>>, %arg4: memref<32x512xbf16, #tpu.memory_space<vmem>>) attributes {dimension_semantics = [#tpu.dimension_semantics<parallel>], iteration_bounds = array<i64: 1>, scalar_prefetch = 0 : i64, scratch_operands = 0 : i64, tpu.core_type = #tpu.core_type<tc>, window_params = [{pipeline_mode = #tpu.pipeline_mode<synchronous>, transform_indices = @transform_0, window_bounds = array<i64: 32, 144>}, {transform_indices = @transform_1, window_bounds = array<i64: 144, 512>}, {pipeline_mode = #tpu.pipeline_mode<synchronous>, transform_indices = @transform_2, window_bounds = array<i64: 32, 1>}, {transform_indices = @transform_3, window_bounds = array<i64: 32, 512>}]} {
    %c0 = arith.constant 0 : index
    %c0_0 = arith.constant 0 : index
    %0 = vector.load %arg1[%c0, %c0_0] : memref<32x144xbf16, #tpu.memory_space<vmem>>, vector<32x144xbf16>
    %c0_1 = arith.constant 0 : index
    %c0_2 = arith.constant 0 : index
    %1 = vector.load %arg2[%c0_1, %c0_2] : memref<144x512xbf16, #tpu.memory_space<vmem>>, vector<144x512xbf16>
    %cst = arith.constant dense<0.000000e+00> : vector<32x512xf32>
    %2 = tpu.matmul %0, %1, %cst {dimension_numbers = #tpu.dot_dimension_numbers<[1], [0], [0], [1], [0, 0, 1, 1], [], []>} : vector<32x144xbf16>, vector<144x512xbf16>, vector<32x512xf32> -> vector<32x512xf32>
    %c0_3 = arith.constant 0 : index
    %c0_4 = arith.constant 0 : index
    %3 = vector.load %arg3[%c0_3, %c0_4] : memref<32x1xf32, #tpu.memory_space<vmem>>, vector<32x1xf32>
    %4 = vector.broadcast %3 : vector<32x1xf32> to vector<32x512xf32>
    %5 = arith.addf %2, %4 : vector<32x512xf32>
    %cst_5 = arith.constant 0.000000e+00 : f32
    %6 = vector.broadcast %cst_5 : f32 to vector<32x512xf32>
    %7 = arith.cmpf oge, %5, %6 : vector<32x512xf32>
    %cst_6 = arith.constant 0.00999999977 : f32
    %8 = vector.broadcast %cst_6 : f32 to vector<32x512xf32>
    %9 = arith.mulf %8, %5 : vector<32x512xf32>
    %10 = arith.select %7, %5, %9 : vector<32x512xi1>, vector<32x512xf32>
    %11 = arith.truncf %10 : vector<32x512xf32> to vector<32x512xbf16>
    %c0_7 = arith.constant 0 : index
    %c0_8 = arith.constant 0 : index
    %12 = vector.load %arg4[%c0_7, %c0_8] : memref<32x512xbf16, #tpu.memory_space<vmem>>, vector<32x512xbf16>
    tpu.vector_store %arg4[%c0_7, %c0_8], %11 {strides = array<i32>} : memref<32x512xbf16, #tpu.memory_space<vmem>>, vector<32x512xbf16>,
    return
  }
  func.func @transform_0(%arg0: i32) -> (i32, i32) {
    %c0_i32 = arith.constant 0 : i32
    %c0_i32_0 = arith.constant 0 : i32
    %c0_i32_1 = arith.constant 0 : i32
    return %c0_i32, %c0_i32_0 : i32, i32
  }
  func.func @transform_1(%arg0: i32) -> (i32, i32) {
    %c0_i32 = arith.constant 0 : i32
    %c0_i32_0 = arith.constant 0 : i32
    return %c0_i32, %arg0 : i32, i32
  }
  func.func @transform_2(%arg0: i32) -> (i32, i32) {
    %c0_i32 = arith.constant 0 : i32
    %c0_i32_0 = arith.constant 0 : i32
    %c0_i32_1 = arith.constant 0 : i32
    return %c0_i32, %c0_i32_0 : i32, i32
  }
  func.func @transform_3(%arg0: i32) -> (i32, i32) {
    %c0_i32 = arith.constant 0 : i32
    %c0_i32_0 = arith.constant 0 : i32
    return %c0_i32, %arg0 : i32, i32
  }
}

module attributes {stable_mosaic.version = 11 : i64} {
  func.func @_fused_mm_kernel(%arg0: i32, %arg1: memref<12x72xbf16, #tpu.memory_space<vmem>>, %arg2: memref<72x512xbf16, #tpu.memory_space<vmem>>, %arg3: memref<12x1xf32, #tpu.memory_space<vmem>>, %arg4: memref<12x512xf32, #tpu.memory_space<vmem>>) attributes {dimension_semantics = [#tpu.dimension_semantics<parallel>], iteration_bounds = array<i64: 4>, scalar_prefetch = 0 : i64, scratch_operands = 0 : i64, tpu.core_type = #tpu.core_type<tc>, window_params = [{pipeline_mode = #tpu.pipeline_mode<synchronous>, transform_indices = @transform_0, window_bounds = array<i64: 12, 72>}, {transform_indices = @transform_1, window_bounds = array<i64: 72, 512>}, {pipeline_mode = #tpu.pipeline_mode<synchronous>, transform_indices = @transform_2, window_bounds = array<i64: 12, 1>}, {transform_indices = @transform_3, window_bounds = array<i64: 12, 512>}]} {
    %c0 = arith.constant 0 : index
    %c0_0 = arith.constant 0 : index
    %0 = vector.load %arg1[%c0, %c0_0] : memref<12x72xbf16, #tpu.memory_space<vmem>>, vector<12x72xbf16>
    %c0_1 = arith.constant 0 : index
    %c0_2 = arith.constant 0 : index
    %1 = vector.load %arg2[%c0_1, %c0_2] : memref<72x512xbf16, #tpu.memory_space<vmem>>, vector<72x512xbf16>
    %cst = arith.constant dense<0.000000e+00> : vector<12x512xf32>
    %2 = tpu.matmul %0, %1, %cst {dimension_numbers = #tpu.dot_dimension_numbers<[1], [0], [0], [1], [0, 0, 1, 1], [], []>} : vector<12x72xbf16>, vector<72x512xbf16>, vector<12x512xf32> -> vector<12x512xf32>
    %c0_3 = arith.constant 0 : index
    %c0_4 = arith.constant 0 : index
    %3 = vector.load %arg3[%c0_3, %c0_4] : memref<12x1xf32, #tpu.memory_space<vmem>>, vector<12x1xf32>
    %4 = vector.broadcast %3 : vector<12x1xf32> to vector<12x512xf32>
    %5 = arith.addf %2, %4 : vector<12x512xf32>
    %6 = arith.negf %5 : vector<12x512xf32>
    %7 = math.exp %6 : vector<12x512xf32>
    %cst_5 = arith.constant 1.000000e+00 : f32
    %8 = vector.broadcast %cst_5 : f32 to vector<12x512xf32>
    %9 = arith.addf %8, %7 : vector<12x512xf32>
    %10 = arith.divf %8, %9 : vector<12x512xf32>
    %c0_6 = arith.constant 0 : index
    %c0_7 = arith.constant 0 : index
    %11 = vector.load %arg4[%c0_6, %c0_7] : memref<12x512xf32, #tpu.memory_space<vmem>>, vector<12x512xf32>
    tpu.vector_store %arg4[%c0_6, %c0_7], %10 {strides = array<i32>} : memref<12x512xf32, #tpu.memory_space<vmem>>, vector<12x512xf32>,
    return
  }
  func.func @transform_0(%arg0: i32) -> (i32, i32) {
    %c0_i32 = arith.constant 0 : i32
    %c0_i32_0 = arith.constant 0 : i32
    %c0_i32_1 = arith.constant 0 : i32
    return %c0_i32, %c0_i32_0 : i32, i32
  }
  func.func @transform_1(%arg0: i32) -> (i32, i32) {
    %c0_i32 = arith.constant 0 : i32
    %c0_i32_0 = arith.constant 0 : i32
    return %c0_i32, %arg0 : i32, i32
  }
  func.func @transform_2(%arg0: i32) -> (i32, i32) {
    %c0_i32 = arith.constant 0 : i32
    %c0_i32_0 = arith.constant 0 : i32
    %c0_i32_1 = arith.constant 0 : i32
    return %c0_i32, %c0_i32_0 : i32, i32
  }
  func.func @transform_3(%arg0: i32) -> (i32, i32) {
    %c0_i32 = arith.constant 0 : i32
    %c0_i32_0 = arith.constant 0 : i32
    return %c0_i32, %arg0 : i32, i32
  }
}

</mosaic_0001>

<bundles_post_ra>
// kernel: decoder_forward.4
= control target key start
LH: loop header
LB: loop body
LE: loop exit
PB: predicated region body
PF: predicated region fallthrough
CT: control target
= control target key end

     0   :  { %8 = vsyncpa [#allocation3], 0  ;;  %s1303_s0 = inlined_call_operand.vmem [shape: bf16[8,200], index: 0, kind: input, shape index: {}]   ;;  %s1304_s1 = inlined_call_operand.hbm [shape: bf16[200,2048], index: 1, kind: input, shape index: {}]   ;;  %s1305_s2 = inlined_call_operand.hbm [shape: f32[1,2048], index: 2, kind: input, shape index: {}]   ;;  %s1306_s3 = inlined_call_operand.vmem [shape: bf16[8,2048], index: 3, kind: output, shape index: {}]  }
   0x1   :  { %10 = vsyncpa [#allocation3 + $0x1], 0 }
   0x2   :  { %11 = vsyncpa [#allocation5], 0 }
   0x3   :  { %13 = vsyncpa [#allocation5 + $0x1], 0  ;;  %s1100_s12 = smov 0   ;;  %s1102_s13 = smov 0  }
   0x4   :  { %s1104_s14 = smov 0   ;;  %s1106_s15 = smov 0  }
   0x5 LB: > { %s769_s16 = sadd.s32 4294967295, %s1073_s15   ;;  %s1120_s17 = sadd.s32 1, %s1073_s15   ;;  %s1073_s15 = sphi %s1106_s15, %s1316_s15   ;;  %s1069_s14 = sphi %s1104_s14, %s1315_s14   ;;  %s1065_s13 = sphi %s1102_s13, %s1314_s13   ;;  %s1061_s12 = sphi %s1100_s12, %s1313_s12  }
   0x6   : > { %s44_s18 = ssub.s32 %s1073_s15, %s1120_s17  ;;  %s47_s19 = sadd.s32 1, %s1069_s14 }
   0x7   : > { %p45_p0 = scmp.eq.s32.totalorder %s44_s18, 0  ;;  %p54_p1 = scmp.ne.s32.totalorder %s1069_s14, %s1065_s13 }
   0x8   : > { %p55_p2 = scmp.eq.s32.totalorder %s1073_s15, 0  ;;  %p60_p3 = scmp.ne.s32.totalorder %s1065_s13, %s1061_s12 }
   0x9   : > { %s1130_s20 = scalar_select %p45_p0, %s1069_s14, %s47_s19  }
   0xa   : > { %p56_p4 = por %p55_p2, %p54_p1  ;;  %p61_p5 = scmp.eq.s32.totalorder %s769_s16, 0 }
   0xb   : > { %p861_p6 = scmp.lt.s32.totalorder %s1073_s15, 4  ;;  %s1140_s22 = sand.u32 1, %s1069_s14  }
   0xc   : > { %p1135_p7 = por %p61_p5, %p60_p3  ;;  %s848_s23 = smul.u32 400, %s1140_s22 }
   0xd   : > { %s844_s24 = sshll.u32 %s1073_s15, 8  ;;  %p1144_p8 = pnand %p861_p6, %p56_p4 }
   0xe   : > { %s1308_s21 = scalar_select %p1135_p7, 1, 0 }
   0xf   : > { %s1151_s28 = scalar_lea.hbm %s1304_s1, %s844_s24  ;;  %s143_s29 = scalar_lea.vmem [#allocation2], %s848_s23 }
  0x10   : > { %s150_s30 = sshll.u32 %s143_s29, 4  ;;  %s140_s4 = scalar_lea.sflag [#allocation3], %s1140_s22  ;;  %s1153_s30 = int_to_ptr.vmem [resolvable:$true] %s150_s30 }
  0x11   : > { %s975_s5 = scalar_lea.hbm %s1151_s28, 6400  ;;  %p977_p10 = pneg %p1144_p8 }
  0x12   : > { %p976_p9 = scmp.ne.s32.totalorder %s1151_s28, %s975_s5  ;;  %s980_s8 = scalar_lea.hbm %s1304_s1, 25600 }
  0x13   : > { %p981_p13 = scmp.lt.u32.totalorder %s1151_s28, %s1304_s1  ;;  %p982_p0 = scmp.lt.u32.totalorder %s980_s8, %s975_s5 }
  0x14   : > { %p978_p11 = pnand %p977_p10, %p976_p9  ;;  %p984_p2 = scmp.lt.u32.totalorder %s975_s5, %s1151_s28 }
  0x15   : > { %p983_p1 = por %p982_p0, %p981_p13 }
  0x16   : > { %p979_p12 = pneg %p978_p11 }
  0x17   : > { %p985_p3 = por %p984_p2, %p983_p1 }
  0x19   : > { %p986_p4 = pnand %p985_p3, %p979_p12 }
  0x1b   : > { %989 = shalt.err (!%p986_p4)
}
  0x1c   : > { %s990_s11 = scalar_lea.vmem %s1153_s30, 6400  ;;  %s1075_s12 = smov [#allocation2]  }
  0x1d   : > { %p991_p5 = scmp.ne.s32.totalorder %s1153_s30, %s990_s11  ;;  %s995_s18 = sshll.u32 %s1075_s12, 4  ;;  %s996_s18 = int_to_ptr.vmem [resolvable:$false] %s995_s18 }
  0x1e   : > { %s997_s19 = scalar_lea.vmem %s996_s18, 12800  ;;  %p998_p11 = scmp.lt.s32.totalorder %s1153_s30, %s996_s18 }
  0x1f   : > { %p993_p6 = pnand %p991_p5, %p977_p10  ;;  %p999_p13 = scmp.lt.s32.totalorder %s997_s19, %s990_s11 }
  0x21   : > { %p994_p9 = pneg %p993_p6  ;;  %p1000_p0 = por %p999_p13, %p998_p11 }
  0x23   : > { %p1001_p1 = pnand %p1000_p0, %p994_p9 }
  0x25   : > { %1004 = shalt.err (!%p1001_p1)
}
  0x26   : > { %s1076_s23 = smov 1024   ;;  %s1077_s24 = smov 256  }
  0x27   : > { %s1078_s26 = smov 16   ;;  %p778_p12 = scmp.ge.s32.totalorder %s1073_s15, 1 }
  0x28   : > { %857 = dma.hbm_to_vmem [thread:$0]  (!%p1144_p8), %s1151_s28, 6400, %s1153_s30, %s140_s4, %s1076_s23, %s1077_s24, %s1078_s26  }
  0x29   : > { %p177_p2 = scmp.lt.s32.totalorder %s1073_s15, 5  ;;  %s775_s27 = sshll.u32 %s1140_s22, 2 }
  0x2a   : > { %s845_s5 = sshll.u32 %s1073_s15, 6  ;;  %s164_s6 = scalar_lea.vmem [#allocation4], %s775_s27 }
  0x2b   : > { %p1186_p3 = pnand %p778_p12, %p177_p2  ;;  %s172_s7 = sshll.u32 %s164_s6, 4  ;;  %s173_s7 = int_to_ptr.vmem [resolvable:$true] %s172_s7 }
  0x2c   : > { %s1194_s10 = scalar_lea.hbm %s1305_s2, %s845_s5  ;;  %s161_s28 = scalar_lea.sflag [#allocation5], %s1140_s22 }
  0x2d   : > { %s1310_s29 = scalar_select %p1186_p3, 1, 0 }
  0x2e   : > { %s1005_s30 = scalar_lea.hbm %s1194_s10, 64  ;;  %s1010_s12 = scalar_lea.hbm %s1305_s2, 256 }
  0x2f   : > { %p1006_p4 = scmp.ne.s32.totalorder %s1194_s10, %s1005_s30  ;;  %p1011_p9 = scmp.lt.u32.totalorder %s1194_s10, %s1305_s2 }
  0x30   : > { %p1012_p11 = scmp.lt.u32.totalorder %s1010_s12, %s1005_s30  ;;  %p1014_p0 = scmp.lt.u32.totalorder %s1005_s30, %s1194_s10 }
  0x31   : > { %p1008_p5 = pnand %p1006_p4, %p977_p10 }
  0x32   : > { %p1013_p13 = por %p1012_p11, %p1011_p9 }
  0x33   : > { %p1009_p6 = pneg %p1008_p5 }
  0x34   : > { %p1015_p1 = por %p1014_p0, %p1013_p13 }
  0x36   : > { %p1016_p12 = pnand %p1015_p1, %p1009_p6 }
  0x38   : > { %1019 = shalt.err (!%p1016_p12)
}
  0x39   : > { %s1020_s22 = scalar_lea.vmem %s173_s7, 64  ;;  %s1079_s23 = smov [#allocation4]  }
  0x3a   : > { %p1021_p2 = scmp.ne.s32.totalorder %s173_s7, %s1020_s22  ;;  %s1025_s24 = sshll.u32 %s1079_s23, 4  ;;  %s1026_s24 = int_to_ptr.vmem [resolvable:$false] %s1025_s24 }
  0x3b   : > { %s1027_s26 = scalar_lea.vmem %s1026_s24, 128  ;;  %p1028_p7 = scmp.lt.s32.totalorder %s173_s7, %s1026_s24 }
  0x3c   : > { %p1023_p4 = pnand %p1021_p2, %p977_p10  ;;  %p1029_p3 = scmp.lt.s32.totalorder %s1027_s26, %s1020_s22 }
  0x3e   : > { %p1024_p5 = pneg %p1023_p4  ;;  %p1030_p9 = por %p1029_p3, %p1028_p7 }
  0x40   : > { %p1031_p11 = pnand %p1030_p9, %p1024_p5 }
  0x42   : > { %1034 = shalt.err (!%p1031_p11)
}
  0x43   : > { %860 = dma.hbm_to_vmem [thread:$0]  (!%p1144_p8), %s1194_s10, 64, %s173_s7, %s161_s28  }
  0x44   : > { %p1311_p6 = scmp.ne.s32.totalorder %s1310_s29, 0 }
  0x45   : > { %s183_s27 = sand.u32 (!%p1311_p6), 1, %s1065_s13   ;;  %p1312_p10 = scmp.ne.s32.totalorder (!%p1311_p6), %s1308_s21, 0 }
  0x46   : > { %181 = sbr.rel (%p1311_p6) target bundleno = 352 (0x160), region = 32  ;;  %s184_s6 = scalar_lea.sflag (!%p1311_p6), [#allocation3], %s183_s27 }
  0x47   : > { %s849_s5 = smul.u32 (!%p1311_p6), 400, %s183_s27 }
  0x49   : > { %s1219_s8 = scalar_lea.vmem (!%p1311_p6), [#allocation2], %s849_s5 }
  0x4d   : > { %1052 = dma.done.wait (%p1312_p10), %s184_s6, 6400  }
  0x4e   : > { %1054 = vsyncadd (%p1312_p10), %s184_s6, 4294960896  ;;  %s779_s9 = sshll.u32 %s183_s27, 2  ;;  %s193_s25 = scalar_lea.sflag [#allocation5], %s183_s27 }
  0x4f   : > { %s1225_s30 = scalar_lea.vmem [#allocation4], %s779_s9 }
  0x50   : > { %1056 = dma.done.wait (%p1312_p10), %s193_s25, 64  }
  0x51   : > { %1058 = vsyncadd (%p1312_p10), %s193_s25, 4294967232  ;;  %v897_v0 = vld [vmem:[%s1219_s8 + $0x4] ss:$16 sps:$4 sm:$0xff]   ;;  %v899_v1 = vld [vmem:[%s1219_s8 + $0xc] ss:$16 sps:$4 sm:$0xff]   ;;  %vm562_vm0 = vcmask 588800   ;;  %v286_v59 = vlaneseq }
  0x52   : > { %579 = vmatprep.subr.bf16.mxu0 %v897_v0  ;;  %v901_v2 = vld [vmem:[%s1219_s8] ss:$16 sps:$4 sm:$0xff]   ;;  %v902_v3 = vld [vmem:[%s1219_s8 + $0x8] ss:$16 sps:$4 sm:$0xff]   ;;  %620 = vmatprep.subr.bf16.mxu1 %v899_v1  ;;  %v903_v4 = vld [vmem:[%s1219_s8 + $0x24] ss:$16 sps:$4 sm:$0xff]  }
  0x53   : > { %580 = vmatpush1.bf16.msra.mxu0 %v901_v2  ;;  %621 = vmatpush1.bf16.msra.mxu1 %v902_v3  ;;  %v905_v5 = vld [vmem:[%s1219_s8 + $0x2c] ss:$16 sps:$4 sm:$0xff]   ;;  %v907_v6 = vld [vmem:[%s1219_s8 + $0x20] ss:$16 sps:$4 sm:$0xff]   ;;  %v908_v7 = vld [vmem:[%s1219_s8 + $0x28] ss:$16 sps:$4 sm:$0xff]  }
  0x54   : > { %581 = vmatprep.subr.bf16.mxu0 %v903_v4  ;;  %622 = vmatprep.subr.bf16.mxu1 %v905_v5  ;;  %v909_v8 = vld [vmem:[%s1219_s8 + $0x44] ss:$16 sps:$4 sm:$0xff]   ;;  %v911_v9 = vld [vmem:[%s1219_s8 + $0x4c] ss:$16 sps:$4 sm:$0xff]   ;;  %v913_v10 = vld [vmem:[%s1219_s8 + $0x40] ss:$16 sps:$4 sm:$0xff]  }
  0x55   : > { %v914_v11 = vld [vmem:[%s1219_s8 + $0x48] ss:$16 sps:$4 sm:$0xff]   ;;  %v915_v12 = vld [vmem:[%s1219_s8 + $0x64] ss:$16 sps:$4 sm:$0xff]   ;;  %v917_v13 = vld [vmem:[%s1219_s8 + $0x6c] ss:$16 sps:$4 sm:$0xff]  }
  0x56   : > { %v919_v14 = vld [vmem:[%s1219_s8 + $0x60] ss:$16 sps:$4 sm:$0xff]   ;;  %v920_v15 = vld [vmem:[%s1219_s8 + $0x68] ss:$16 sps:$4 sm:$0xff]   ;;  %v921_v16 = vld [vmem:[%s1219_s8 + $0x84] ss:$16 sps:$4 sm:$0xff]  }
  0x57   : > { %582 = vmatpush1.bf16.msra.mxu0 %v907_v6  ;;  %623 = vmatpush1.bf16.msra.mxu1 %v908_v7  ;;  %v923_v17 = vld [vmem:[%s1219_s8 + $0x8c] ss:$16 sps:$4 sm:$0xff]   ;;  %v925_v18 = vld [vmem:[%s1219_s8 + $0x80] ss:$16 sps:$4 sm:$0xff]   ;;  %v926_v19 = vld [vmem:[%s1219_s8 + $0x88] ss:$16 sps:$4 sm:$0xff]  }
  0x58   : > { %583 = vmatprep.subr.bf16.mxu0 %v909_v8  ;;  %624 = vmatprep.subr.bf16.mxu1 %v911_v9  ;;  %v927_v20 = vld [vmem:[%s1219_s8 + $0xa4] ss:$16 sps:$4 sm:$0xff]   ;;  %v929_v21 = vld [vmem:[%s1219_s8 + $0xac] ss:$16 sps:$4 sm:$0xff]   ;;  %v931_v22 = vld [vmem:[%s1219_s8 + $0xa0] ss:$16 sps:$4 sm:$0xff]  }
  0x59   : > { %v932_v23 = vld [vmem:[%s1219_s8 + $0xa8] ss:$16 sps:$4 sm:$0xff]   ;;  %v933_v24 = vld [vmem:[%s1219_s8 + $0xc4] ss:$16 sps:$4 sm:$0xff]   ;;  %v935_v25 = vld [vmem:[%s1219_s8 + $0xcc] ss:$16 sps:$4 sm:$0xff]  }
  0x5a   : > { %v937_v26 = vld [vmem:[%s1219_s8 + $0xc0] ss:$16 sps:$4 sm:$0xff]   ;;  %v938_v27 = vld [vmem:[%s1219_s8 + $0xc8] ss:$16 sps:$4 sm:$0xff]   ;;  %v939_v28 = vld [vmem:[%s1219_s8 + $0xe4] ss:$16 sps:$4 sm:$0xff]  }
  0x5b   : > { %584 = vmatpush1.bf16.msra.mxu0 %v913_v10  ;;  %625 = vmatpush1.bf16.msra.mxu1 %v914_v11  ;;  %v941_v29 = vld [vmem:[%s1219_s8 + $0xec] ss:$16 sps:$4 sm:$0xff]   ;;  %v943_v30 = vld [vmem:[%s1219_s8 + $0xe0] ss:$16 sps:$4 sm:$0xff]   ;;  %v944_v31 = vld [vmem:[%s1219_s8 + $0xe8] ss:$16 sps:$4 sm:$0xff]  }
  0x5c   : > { %585 = vmatprep.subr.bf16.mxu0 %v915_v12  ;;  %626 = vmatprep.subr.bf16.mxu1 %v917_v13  ;;  %v945_v32 = vld [vmem:[%s1219_s8 + $0x104] ss:$16 sps:$4 sm:$0xff]   ;;  %v947_v33 = vld [vmem:[%s1219_s8 + $0x10c] ss:$16 sps:$4 sm:$0xff]   ;;  %v949_v34 = vld [vmem:[%s1219_s8 + $0x100] ss:$16 sps:$4 sm:$0xff]  }
  0x5d   : > { %v950_v35 = vld [vmem:[%s1219_s8 + $0x108] ss:$16 sps:$4 sm:$0xff]   ;;  %v233_v36 = vld [vmem:[%s1303_s0] sm:$0xff]  ;;  %v953_v38 = vld [vmem:[%s1219_s8 + $0x12c] ss:$16 sps:$4 sm:$0xff]   ;;  %vm566_vm1 = vcmask 1043456  }
  0x5e   : > { %v951_v37 = vld [vmem:[%s1219_s8 + $0x124] ss:$16 sps:$4 sm:$0xff]   ;;  %v783_v39 = vcombine.high %v233_v36, %v233_v36  ;;  %v955_v40 = vld [vmem:[%s1219_s8 + $0x120] ss:$16 sps:$4 sm:$0xff]   ;;  %v956_v41 = vld [vmem:[%s1219_s8 + $0x128] ss:$16 sps:$4 sm:$0xff]   ;;  %v782_v58 = vcombine.low %v233_v36, %v233_v36 }
  0x5f   : > { %586 = vmatpush1.bf16.msra.mxu0 %v919_v14  ;;  %627 = vmatpush1.bf16.msra.mxu1 %v920_v15  ;;  %v957_v42 = vld [vmem:[%s1219_s8 + $0x144] ss:$16 sps:$4 sm:$0xff]   ;;  %v959_v43 = vld [vmem:[%s1219_s8 + $0x14c] ss:$16 sps:$4 sm:$0xff]   ;;  %v961_v44 = vld [vmem:[%s1219_s8 + $0x140] ss:$16 sps:$4 sm:$0xff]  }
  0x60   : > { %587 = vmatprep.subr.bf16.mxu0 %v921_v16  ;;  %628 = vmatprep.subr.bf16.mxu1 %v923_v17  ;;  %v962_v45 = vld [vmem:[%s1219_s8 + $0x148] ss:$16 sps:$4 sm:$0xff]   ;;  %v963_v46 = vld [vmem:[%s1219_s8 + $0x164] ss:$16 sps:$4 sm:$0xff]   ;;  %v965_v47 = vld [vmem:[%s1219_s8 + $0x16c] ss:$16 sps:$4 sm:$0xff]  }
  0x61   : > { %837 = vmatprep.mubr.msk.bf16.mxu0 %vm562_vm0, %v783_v39  ;;  %839 = vmatprep.mubr.msk.bf16.mxu1 %vm562_vm0, %v783_v39  ;;  %v282_v48 = vld [vmem:[%s1219_s8 + $0x180] sm:$0xff]  ;;  %v283_v49 = vld [vmem:[%s1219_s8 + $0x188] sm:$0xff]  ;;  %v287_v60 = vshrl.u32 %v286_v59, 7  ;;  %s780_s7 = sshll.u32 %s769_s16, 2 }
  0x62   : > { %v967_v50 = vld [vmem:[%s1219_s8 + $0x160] ss:$16 sps:$4 sm:$0xff]   ;;  %v968_v51 = vld [vmem:[%s1219_s8 + $0x168] ss:$16 sps:$4 sm:$0xff]   ;;  %v833_v52 = vcombine.high %v282_v48, %v282_v48  ;;  %v835_v53 = vcombine.high %v283_v49, %v283_v49  ;;  %v832_v54 = vcombine.low %v282_v48, %v282_v48  ;;  %v834_v55 = vcombine.low %v283_v49, %v283_v49  ;;  %p227_p7 = scmp.lt.s32.totalorder %s780_s7, 15 }
  0x63   : > { %588 = vmatpush1.bf16.msra.mxu0 %v925_v18  ;;  %629 = vmatpush1.bf16.msra.mxu1 %v926_v19  ;;  %v288_v61 = vsub.s32 0, %v287_v60  ;;  %v296_v62 = vsub.s32 2, %v287_v60  ;;  %v284_v63 = vld [vmem:[%s1225_s30] sm:$0xf]  ;;  %v292_v0 = vsub.s32 1, %v287_v60  ;;  %v300_v1 = vsub.s32 3, %v287_v60 }
  0x64   : > { %589 = vmatprep.subr.bf16.mxu0 %v927_v20  ;;  %630 = vmatprep.subr.bf16.mxu1 %v929_v21  ;;  %v568_v56 = vsel %vm566_vm1, %v832_v54, 0  ;;  %v574_v57 = vsel %vm566_vm1, %v834_v55, 0  ;;  %s1318_s7 = smov (!%p227_p7, %s780_s7), 15 }
  0x65   : > { %v289_v2 = vrot.slane %v284_v63, %v288_v61  ;;  %v297_v3 = vrot.slane %v284_v63, %v296_v62  ;;  %v293_v4 = vrot.slane %v284_v63, %v292_v0  ;;  %v301_v5 = vrot.slane %v284_v63, %v300_v1  ;;  %s781_s10 = sshll.u32 %s1318_s7, 2 }
  0x66   : > { %s230_s28 = scalar_lea.vmem %s1306_s3, %s781_s10 }
  0x67   : > { %590 = vmatpush1.bf16.msra.mxu0 %v931_v22  ;;  %631 = vmatpush1.bf16.msra.mxu1 %v932_v23 }
  0x68   : > { %591 = vmatprep.subr.bf16.mxu0 %v933_v24  ;;  %632 = vmatprep.subr.bf16.mxu1 %v935_v25 }
  0x6b   : > { %592 = vmatpush1.bf16.msra.mxu0 %v937_v26  ;;  %633 = vmatpush1.bf16.msra.mxu1 %v938_v27 }
  0x6c   : > { %593 = vmatprep.subr.bf16.mxu0 %v939_v28  ;;  %634 = vmatprep.subr.bf16.mxu1 %v941_v29 }
  0x6f   : > { %594 = vmatpush1.bf16.msra.mxu0 %v943_v30  ;;  %635 = vmatpush1.bf16.msra.mxu1 %v944_v31 }
  0x70   : > { %595 = vmatprep.subr.bf16.mxu0 %v945_v32  ;;  %636 = vmatprep.subr.bf16.mxu1 %v947_v33 }
  0x73   : > { %596 = vmatpush1.bf16.msra.mxu0 %v949_v34  ;;  %637 = vmatpush1.bf16.msra.mxu1 %v950_v35 }
  0x74   : > { %597 = vmatprep.subr.bf16.mxu0 %v951_v37  ;;  %638 = vmatprep.subr.bf16.mxu1 %v953_v38 }
  0x77   : > { %598 = vmatpush1.bf16.msra.mxu0 %v955_v40  ;;  %639 = vmatpush1.bf16.msra.mxu1 %v956_v41 }
  0x78   : > { %599 = vmatprep.subr.bf16.mxu0 %v957_v42  ;;  %640 = vmatprep.subr.bf16.mxu1 %v959_v43 }
  0x7b   : > { %600 = vmatpush1.bf16.msra.mxu0 %v961_v44  ;;  %641 = vmatpush1.bf16.msra.mxu1 %v962_v45 }
  0x7c   : > { %601 = vmatprep.subr.bf16.mxu0 %v963_v46  ;;  %642 = vmatprep.subr.bf16.mxu1 %v965_v47 }
  0x7f   : > { %602 = vmatpush1.bf16.msra.mxu0 %v967_v50  ;;  %643 = vmatpush1.bf16.msra.mxu1 %v968_v51 }
  0x80   : > { %836 = vmatprep.subr.msk.bf16.mxu0 %vm566_vm1, %v833_v52  ;;  %838 = vmatprep.subr.msk.bf16.mxu1 %vm566_vm1, %v835_v53 }
  0x83   : > { %604 = vmatpush1.bf16.msra.mxu0 %v568_v56  ;;  %645 = vmatpush1.bf16.msra.mxu1 %v574_v57 }
  0x86   : > { %612 = vmatmul.mubr.bf16.vlgmr.msra.gmra.mrb[0].mxu0 %v782_v58  ;;  %653 = vmatmul.mubr.bf16.vlgmr.msra.gmra.mrb[0].mxu1 %v782_v58 }
 0x159   : > { %v613_v6 = vpop.f32.mrb[0].mxu0  ;;  %v654_v7 = vpop.f32.mrb[0].mxu1 }
 0x15a   : > { %v614_v8 = vadd.f32 %v613_v6, %v289_v2  ;;  %v655_v9 = vadd.f32 %v654_v7, %v297_v3  ;;  %v615_v10 = vpop.f32.mrb[1].mxu0  ;;  %v656_v11 = vpop.f32.mrb[1].mxu1 }
 0x15b   : > { %v616_v12 = vadd.f32 %v615_v10, %v293_v4  ;;  %v657_v13 = vadd.f32 %v656_v11, %v301_v5  ;;  %v617_v14 = vpop.f32.mrb[2].mxu0  ;;  %v658_v15 = vpop.f32.mrb[2].mxu1 }
 0x15c   : > { %v618_v16 = vpop.f32.mrb[3].mxu0  ;;  %v659_v17 = vpop.f32.mrb[3].mxu1 }
 0x15d   : > { %v846_v18 = vpack.c.bf16 %v616_v12, %v614_v8  ;;  %v847_v19 = vpack.c.bf16 %v657_v13, %v655_v9 }
 0x15f   : > { %677 = vst [vmem:[%s230_s28] sm:$0xff] %v846_v18  ;;  %678 = vst [vmem:[%s230_s28 + $0x8] sm:$0xff] %v847_v19 }
 0x160 PF: > { %p16_p8 = scmp.ge.s32.totalorder %s1120_s17, 6   ;;  %s1313_s12 = smov %s1065_s13 }
 0x161   : > { %s1314_s13 = smov %s1069_s14  ;;  %s1315_s14 = smov %s1130_s20 }
 0x162   : > { %s1316_s15 = smov %s1120_s17  ;;  %18 = sbr.rel (!%p16_p8) target bundleno = 5 (0x5), region = 85 }
 0x169   :  { %701 = vsyncpa [#allocation3], 1 }
 0x16a   :  { %703 = vsyncpa [#allocation3 + $0x1], 1 }
 0x16b   :  { %704 = vsyncpa [#allocation5], 1 }
 0x16c   :  { %706 = vsyncpa [#allocation5 + $0x1], 1 }

// kernel: decoder_forward.5
= control target key start
LH: loop header
LB: loop body
LE: loop exit
PB: predicated region body
PF: predicated region fallthrough
CT: control target
= control target key end

     0   :  { %v678_v1 = vmov 0   ;;  %vm283_vm0 = vcmask 261120   ;;  %s830_s1 = inlined_call_operand.vmem [shape: bf16[288,128], index: 1, kind: input, shape index: {}]   ;;  %s831_s0 = inlined_call_operand.vmem [shape: bf16[64,288], index: 0, kind: input, shape index: {}]   ;;  %s832_s2 = inlined_call_operand.vmem [shape: f32[64,1], index: 2, kind: input, shape index: {}]   ;;  %s833_s3 = inlined_call_operand.vmem [shape: bf16[64,128], index: 3, kind: output, shape index: {}]  }
   0x1   :  { %v644_v0 = vld [vmem:[%s830_s1 + $0x40] sm:$0xff]   ;;  %643 = vset.pattern.permute.xlu1 %v678_v1  ;;  %642 = vset.pattern.permute.xlu0 %v678_v1  ;;  %v646_v3 = vld [vmem:[%s830_s1 + $0x48] sm:$0xff]   ;;  %v648_v5 = vld [vmem:[%s830_s1 + $0x50] sm:$0xff]  }
   0x2   :  { %v645_v2 = vld [vmem:[%s830_s1] sm:$0xff]   ;;  %567 = vmatprep.subr.bf16.mxu0 %v644_v0  ;;  %625 = vmatprep.subr.bf16.mxu1 %v644_v0  ;;  %v647_v4 = vld [vmem:[%s830_s1 + $0x8] sm:$0xff]   ;;  %v649_v6 = vld [vmem:[%s830_s1 + $0x10] sm:$0xff]  }
   0x3   :  { %568 = vmatpush3.bf16.msra.mxu0 %v645_v2  ;;  %633 = vmatpush3.bf16.msra.mxu1 %v645_v2  ;;  %v650_v7 = vld [vmem:[%s830_s1 + $0x58] sm:$0xff]   ;;  %v652_v9 = vld [vmem:[%s830_s1 + $0x60] sm:$0xff]   ;;  %v654_v11 = vld [vmem:[%s830_s1 + $0x68] sm:$0xff]  }
   0x4   :  { %569 = vmatprep.subr.bf16.mxu0 %v646_v3  ;;  %626 = vmatprep.subr.bf16.mxu1 %v646_v3  ;;  %v651_v8 = vld [vmem:[%s830_s1 + $0x18] sm:$0xff]   ;;  %v653_v10 = vld [vmem:[%s830_s1 + $0x20] sm:$0xff]   ;;  %v655_v14 = vld [vmem:[%s830_s1 + $0x28] sm:$0xff]  }
   0x5   :  { %v662_v12 = vld [vmem:[%s831_s0 + $0x4] ss:$12 sps:$4 sm:$0xff]   ;;  %v665_v13 = vld [vmem:[%s831_s0 + $0x4c] ss:$12 sps:$4 sm:$0xff]   ;;  %v663_v23 = vld [vmem:[%s831_s0 + $0x48] ss:$12 sps:$4 sm:$0xff]  }
   0x6   :  { %v656_v15 = vld [vmem:[%s830_s1 + $0x70] sm:$0xff]   ;;  %328 = vmatprep.mubr.bf16.mxu0 %v662_v12  ;;  %352 = vmatprep.mubr.bf16.mxu1 %v665_v13  ;;  %v658_v17 = vld [vmem:[%s830_s1 + $0x78] sm:$0xff]   ;;  %v67_v20 = vld [vmem:[%s832_s2] sm:$0xff] }
   0x7   :  { %570 = vmatpush3.bf16.msra.mxu0 %v647_v4  ;;  %634 = vmatpush3.bf16.msra.mxu1 %v647_v4  ;;  %v657_v16 = vld [vmem:[%s830_s1 + $0x30] sm:$0xff]   ;;  %v659_v18 = vld [vmem:[%s830_s1 + $0x38] sm:$0xff]   ;;  %v666_v21 = vld [vmem:[%s830_s1 + $0x80] sm:$0xff]  }
   0x8   :  { %571 = vmatprep.subr.bf16.mxu0 %v648_v5  ;;  %627 = vmatprep.subr.bf16.mxu1 %v648_v5  ;;  %v69_v19 = vld [vmem:[%s832_s2 + $0x10] sm:$0xff]  ;;  %v660_v22 = vld [vmem:[%s831_s0] ss:$12 sps:$4 sm:$0xff]   ;;  %v70_v24 = vld [vmem:[%s832_s2 + $0x18] sm:$0xff] }
   0x9   :  { %87 = vperm.xlu1 %643, %v69_v19   ;;  %77 = vperm.xlu0 %642, %v67_v20   ;;  %v68_v25 = vld [vmem:[%s832_s2 + $0x8] sm:$0xff]  ;;  %v71_v30 = vld [vmem:[%s832_s2 + $0x20] sm:$0xff]  ;;  %v74_v33 = vld [vmem:[%s832_s2 + $0x38] sm:$0xff] }
   0xa   :  { %v668_v26 = vld [vmem:[%s831_s0 + $0x1c] ss:$12 sps:$4 sm:$0xff]   ;;  %v671_v31 = vld [vmem:[%s831_s0 + $0x18] ss:$12 sps:$4 sm:$0xff]   ;;  %v672_v32 = vld [vmem:[%s831_s0 + $0x20] ss:$12 sps:$4 sm:$0xff]  }
   0xb   :  { %572 = vmatpush3.bf16.msra.mxu0 %v649_v6  ;;  %635 = vmatpush3.bf16.msra.mxu1 %v649_v6  ;;  %v667_v27 = vld [vmem:[%s830_s1 + $0x88] sm:$0xff]   ;;  %v73_v34 = vld [vmem:[%s832_s2 + $0x30] sm:$0xff]  ;;  %v675_v36 = vld [vmem:[%s831_s0 + $0x38] ss:$12 sps:$4 sm:$0xff]  }
   0xc   :  { %573 = vmatprep.subr.bf16.mxu0 %v650_v7  ;;  %628 = vmatprep.subr.bf16.mxu1 %v650_v7  ;;  %v670_v28 = vld [vmem:[%s831_s0 + $0x8] ss:$12 sps:$4 sm:$0xff]   ;;  %v676_v37 = vld [vmem:[%s831_s0 + $0x30] ss:$12 sps:$4 sm:$0xff]  }
   0xd   :  { %92 = vperm.xlu1 %643, %v70_v24   ;;  %82 = vperm.xlu0 %642, %v68_v25   ;;  %v72_v29 = vld [vmem:[%s832_s2 + $0x28] sm:$0xff]  ;;  %v673_v35 = vld [vmem:[%s831_s0 + $0x34] ss:$12 sps:$4 sm:$0xff]   ;;  %v677_v38 = vld [vmem:[%s831_s0 + $0x50] ss:$12 sps:$4 sm:$0xff]  }
   0xf   :  { %574 = vmatpush3.bf16.msra.mxu0 %v651_v8  ;;  %636 = vmatpush3.bf16.msra.mxu1 %v651_v8 }
  0x10   :  { %575 = vmatprep.subr.bf16.mxu0 %v652_v9  ;;  %629 = vmatprep.subr.bf16.mxu1 %v652_v9 }
  0x11   :  { %102 = vperm.xlu1 %643, %v72_v29   ;;  %97 = vperm.xlu0 %642, %v71_v30  }
  0x13   :  { %576 = vmatpush3.bf16.msra.mxu0 %v653_v10  ;;  %637 = vmatpush3.bf16.msra.mxu1 %v653_v10 }
  0x14   :  { %577 = vmatprep.subr.bf16.mxu0 %v654_v11  ;;  %630 = vmatprep.subr.bf16.mxu1 %v654_v11 }
  0x15   :  { %112 = vperm.xlu1 %643, %v74_v33   ;;  %107 = vperm.xlu0 %642, %v73_v34  }
  0x17   :  { %578 = vmatpush3.bf16.msra.mxu0 %v655_v14  ;;  %638 = vmatpush3.bf16.msra.mxu1 %v655_v14 }
  0x18   :  { %579 = vmatprep.subr.bf16.mxu0 %v656_v15  ;;  %631 = vmatprep.subr.bf16.mxu1 %v656_v15 }
  0x1b   :  { %580 = vmatpush3.bf16.msra.mxu0 %v657_v16  ;;  %639 = vmatpush3.bf16.msra.mxu1 %v657_v16 }
  0x1c   :  { %581 = vmatprep.subr.bf16.mxu0 %v658_v17  ;;  %632 = vmatprep.subr.bf16.mxu1 %v658_v17 }
  0x1f   :  { %582 = vmatpush3.bf16.msra.mxu0 %v659_v18  ;;  %640 = vmatpush3.bf16.msra.mxu1 %v659_v18 }
  0x20   :  { %613 = vmatprep.subr.bf16.mxu1 %v666_v21 }
  0x22   :  { %329 = vmatmul.mubr.bf16.vlgmr.msra.gmra.mrb[0].mxu0 %v660_v22  ;;  %353 = vmatmul.mubr.bf16.vlgmr.msra.gmra.mrb[0].mxu1 %v663_v23 }
  0x23   :  { %614 = vmatpush3.bf16.msra.mxu1 %v666_v21  ;;  %336 = vmatprep.mubr.bf16.mxu0 %v668_v26 }
  0x24   :  { %615 = vmatprep.subr.bf16.mxu1 %v667_v27  ;;  %617 = vmatprep.mubr.msk.bf16.mxu1 %vm283_vm0, %v670_v28 }
  0x27   :  { %616 = vmatpush3.bf16.msra.mxu1 %v667_v27 }
  0x2a   :  { %337 = vmatmul.mubr.bf16.gmra.mrb[4].mxu0 %v671_v31  ;;  %618 = vmatmul.mubr.msk.bf16.vlgmr.msra.gmra.mrb[4].mxu1 %vm283_vm0, %v672_v32 }
  0x2b   :  { %344 = vmatprep.mubr.bf16.mxu0 %v673_v35  ;;  %621 = vmatprep.mubr.msk.bf16.mxu1 %vm283_vm0, %v675_v36 }
  0x32   :  { %345 = vmatmul.mubr.bf16.gmra.mrb[8].mxu0 %v676_v37  ;;  %622 = vmatmul.mubr.msk.bf16.gmra.mrb[8].mxu1 %vm283_vm0, %v677_v38 }
  0x88   :  { %v88_v39 = vpop.permute.xlu1 %87  ;;  %v78_v40 = vpop.permute.xlu0 %77 }
  0x8c   :  { %v93_v41 = vpop.permute.xlu1 %92  ;;  %v83_v42 = vpop.permute.xlu0 %82 }
  0x90   :  { %v98_v55 = vpop.permute.xlu0 %97  ;;  %v103_v56 = vpop.permute.xlu1 %102 }
  0x94   :  { %v108_v5 = vpop.permute.xlu0 %107  ;;  %v113_v8 = vpop.permute.xlu1 %112 }
  0xf5   :  { %v583_v43 = vpop.f32.mrb[0].mxu0  ;;  %v601_v44 = vpop.f32.mrb[0].mxu1 }
  0xf6   :  { %v584_v45 = vpop.f32.mrb[1].mxu0  ;;  %v602_v46 = vpop.f32.mrb[1].mxu1 }
  0xf7   :  { %v585_v47 = vadd.f32 %v584_v45, %v583_v43  ;;  %v586_v48 = vpop.f32.mrb[2].mxu0  ;;  %v603_v49 = vadd.f32 %v602_v46, %v601_v44  ;;  %v604_v50 = vpop.f32.mrb[2].mxu1 }
  0xf8   :  { %v587_v51 = vpop.f32.mrb[3].mxu0  ;;  %v605_v52 = vpop.f32.mrb[3].mxu1 }
  0xf9   :  { %v588_v53 = vadd.f32 %v587_v51, %v586_v48  ;;  %v606_v54 = vadd.f32 %v605_v52, %v604_v50  ;;  %v331_v59 = vadd.f32 %v585_v47, %v78_v40  ;;  %v355_v13 = vadd.f32 %v603_v49, %v108_v5 }
  0xfb   :  { %v334_v3 = vadd.f32 %v588_v53, %v83_v42  ;;  %v358_v15 = vadd.f32 %v606_v54, %v113_v8 }
  0xfd   :  { %v589_v57 = vpop.f32.mrb[4].mxu0  ;;  %v619_v58 = vpop.f32.mrb[4].mxu1 }
  0xfe   :  { %v590_v60 = vpop.f32.mrb[5].mxu0  ;;  %v395_v61 = vpop.f32.mrb[5].mxu1 }
  0xff   :  { %v591_v62 = vadd.f32 %v590_v60, %v589_v57  ;;  %v396_v63 = vadd.f32 %v395_v61, %v331_v59  ;;  %v592_v0 = vpop.f32.mrb[6].mxu0  ;;  %v620_v1 = vpop.f32.mrb[6].mxu1 }
 0x100   :  { %v593_v2 = vpop.f32.mrb[7].mxu0  ;;  %v398_v4 = vpop.f32.mrb[7].mxu1 }
 0x101   :  { %v339_v6 = vadd.f32 %v591_v62, %v88_v39  ;;  %v594_v7 = vadd.f32 %v593_v2, %v592_v0  ;;  %v434_v9 = vmul.f32 0.01, %v396_v63  ;;  %v399_v10 = vadd.f32 %v398_v4, %v334_v3 }
 0x102   :  { %vm426_vm1 = vcmp.ge.f32.partialorder %v396_v63, 0.0 }
 0x103   :  { %v404_v11 = vadd.f32 %v619_v58, %v339_v6  ;;  %v342_v12 = vadd.f32 %v594_v7, %v93_v41  ;;  %vm427_vm2 = vcmp.ge.f32.partialorder %v399_v10, 0.0  ;;  %v435_v14 = vmul.f32 0.01, %v399_v10 }
 0x104   :  { %v442_v20 = vsel %vm426_vm1, %v396_v63, %v434_v9 }
 0x105   :  { %v436_v16 = vmul.f32 0.01, %v404_v11  ;;  %v407_v17 = vadd.f32 %v620_v1, %v342_v12  ;;  %v595_v18 = vpop.f32.mrb[8].mxu0  ;;  %v623_v19 = vpop.f32.mrb[8].mxu1  ;;  %vm428_vm3 = vcmp.ge.f32.partialorder %v404_v11, 0.0  ;;  %v443_v21 = vsel %vm427_vm2, %v399_v10, %v435_v14 }
 0x106   :  { %v420_v22 = vadd.f32 %v623_v19, %v355_v13  ;;  %v596_v23 = vpop.f32.mrb[9].mxu0  ;;  %v411_v24 = vpop.f32.mrb[9].mxu1  ;;  %v547_v26 = vpack.c.bf16 %v443_v21, %v442_v20 }
 0x107   :  { %vm429_vm4 = vcmp.ge.f32.partialorder %v407_v17, 0.0  ;;  %v437_v25 = vmul.f32 0.01, %v407_v17  ;;  %v598_v27 = vpop.f32.mrb[10].mxu0  ;;  %v624_v28 = vpop.f32.mrb[10].mxu1  ;;  %v597_v29 = vadd.f32 %v596_v23, %v595_v18  ;;  %v444_v33 = vsel %vm428_vm3, %v404_v11, %v436_v16 }
 0x108   :  { %v423_v30 = vadd.f32 %v624_v28, %v358_v15  ;;  %v599_v31 = vpop.f32.mrb[11].mxu0  ;;  %v414_v32 = vpop.f32.mrb[11].mxu1  ;;  %548 = vst [vmem:[%s833_s3] sm:$0xff] %v547_v26   ;;  %v440_v35 = vmul.f32 0.01, %v420_v22  ;;  %vm432_vm5 = vcmp.ge.f32.partialorder %v420_v22, 0.0 }
 0x109   :  { %v445_v34 = vsel %vm429_vm4, %v407_v17, %v437_v25  ;;  %v600_v36 = vadd.f32 %v599_v31, %v598_v27  ;;  %v347_v38 = vadd.f32 %v597_v29, %v98_v55 }
 0x10a   :  { %v552_v37 = vpack.c.bf16 %v445_v34, %v444_v33  ;;  %vm433_vm6 = vcmp.ge.f32.partialorder %v423_v30, 0.0  ;;  %v441_v39 = vmul.f32 0.01, %v423_v30  ;;  %v448_v42 = vsel %vm432_vm5, %v420_v22, %v440_v35 }
 0x10b   :  { %v350_v40 = vadd.f32 %v600_v36, %v103_v56  ;;  %v412_v41 = vadd.f32 %v411_v24, %v347_v38 }
 0x10c   :  { %564 = vst [vmem:[%s833_s3 + $0x8] sm:$0xff] %v552_v37   ;;  %v449_v43 = vsel %vm433_vm6, %v423_v30, %v441_v39 }
 0x10d   :  { %v415_v44 = vadd.f32 %v414_v32, %v350_v40  ;;  %vm430_vm7 = vcmp.ge.f32.partialorder %v412_v41, 0.0  ;;  %v438_v45 = vmul.f32 0.01, %v412_v41  ;;  %v562_v46 = vpack.c.bf16 %v449_v43, %v448_v42 }
 0x10f   :  { %vm431_vm8 = vcmp.ge.f32.partialorder %v415_v44, 0.0  ;;  %v439_v47 = vmul.f32 0.01, %v415_v44  ;;  %566 = vst [vmem:[%s833_s3 + $0x18] sm:$0xff] %v562_v46   ;;  %v446_v48 = vsel %vm430_vm7, %v412_v41, %v438_v45 }
 0x111   :  { %v447_v49 = vsel %vm431_vm8, %v415_v44, %v439_v47 }
 0x112   :  { %v557_v50 = vpack.c.bf16 %v447_v49, %v446_v48 }
 0x114   :  { %565 = vst [vmem:[%s833_s3 + $0x10] sm:$0xff] %v557_v50  }

// kernel: decoder_forward.6
= control target key start
LH: loop header
LB: loop body
LE: loop exit
PB: predicated region body
PF: predicated region fallthrough
CT: control target
= control target key end

     0   :  { %v621_v1 = vmov 0   ;;  %vm277_vm0 = vcmask 130048   ;;  %s802_s1 = inlined_call_operand.vmem [shape: bf16[144,512], index: 1, kind: input, shape index: {}]   ;;  %s803_s0 = inlined_call_operand.vmem [shape: bf16[32,144], index: 0, kind: input, shape index: {}]   ;;  %s804_s2 = inlined_call_operand.vmem [shape: f32[32,1], index: 2, kind: input, shape index: {}]   ;;  %s805_s3 = inlined_call_operand.vmem [shape: bf16[32,512], index: 3, kind: output, shape index: {}]  }
   0x1   :  { %v561_v0 = vld [vmem:[%s802_s1 + $0x4] ss:$16 sps:$4 sm:$0xff]   ;;  %559 = vset.pattern.permute.xlu0 %v621_v1  ;;  %560 = vset.pattern.permute.xlu1 %v621_v1  ;;  %v563_v2 = vld [vmem:[%s802_s1 + $0xc] ss:$16 sps:$4 sm:$0xff]   ;;  %v565_v3 = vld [vmem:[%s802_s1] ss:$16 sps:$4 sm:$0xff]  }
   0x2   :  { %284 = vmatprep.subr.bf16.mxu0 %v561_v0  ;;  %v566_v4 = vld [vmem:[%s802_s1 + $0x8] ss:$16 sps:$4 sm:$0xff]   ;;  %337 = vmatprep.subr.bf16.mxu1 %v563_v2  ;;  %v567_v5 = vld [vmem:[%s802_s1 + $0x24] ss:$16 sps:$4 sm:$0xff]   ;;  %v569_v6 = vld [vmem:[%s802_s1 + $0x2c] ss:$16 sps:$4 sm:$0xff]  }
   0x3   :  { %285 = vmatpush1.bf16.msra.mxu0 %v565_v3  ;;  %338 = vmatpush1.bf16.msra.mxu1 %v566_v4  ;;  %v571_v7 = vld [vmem:[%s802_s1 + $0x20] ss:$16 sps:$4 sm:$0xff]   ;;  %v572_v8 = vld [vmem:[%s802_s1 + $0x28] ss:$16 sps:$4 sm:$0xff]   ;;  %v573_v9 = vld [vmem:[%s802_s1 + $0x44] ss:$16 sps:$4 sm:$0xff]  }
   0x4   :  { %286 = vmatprep.subr.bf16.mxu0 %v567_v5  ;;  %339 = vmatprep.subr.bf16.mxu1 %v569_v6  ;;  %v575_v10 = vld [vmem:[%s802_s1 + $0x4c] ss:$16 sps:$4 sm:$0xff]   ;;  %v577_v11 = vld [vmem:[%s802_s1 + $0x40] ss:$16 sps:$4 sm:$0xff]   ;;  %v578_v12 = vld [vmem:[%s802_s1 + $0x48] ss:$16 sps:$4 sm:$0xff]  }
   0x5   :  { %v579_v13 = vld [vmem:[%s802_s1 + $0x64] ss:$16 sps:$4 sm:$0xff]   ;;  %v581_v14 = vld [vmem:[%s802_s1 + $0x6c] ss:$16 sps:$4 sm:$0xff]   ;;  %v583_v15 = vld [vmem:[%s802_s1 + $0x60] ss:$16 sps:$4 sm:$0xff]  }
   0x6   :  { %v584_v16 = vld [vmem:[%s802_s1 + $0x68] ss:$16 sps:$4 sm:$0xff]   ;;  %v585_v17 = vld [vmem:[%s802_s1 + $0x84] ss:$16 sps:$4 sm:$0xff]   ;;  %v587_v18 = vld [vmem:[%s802_s1 + $0x8c] ss:$16 sps:$4 sm:$0xff]  }
   0x7   :  { %287 = vmatpush1.bf16.msra.mxu0 %v571_v7  ;;  %340 = vmatpush1.bf16.msra.mxu1 %v572_v8  ;;  %v589_v19 = vld [vmem:[%s802_s1 + $0x80] ss:$16 sps:$4 sm:$0xff]   ;;  %v590_v20 = vld [vmem:[%s802_s1 + $0x88] ss:$16 sps:$4 sm:$0xff]   ;;  %v591_v21 = vld [vmem:[%s802_s1 + $0xa4] ss:$16 sps:$4 sm:$0xff]  }
   0x8   :  { %288 = vmatprep.subr.bf16.mxu0 %v573_v9  ;;  %341 = vmatprep.subr.bf16.mxu1 %v575_v10  ;;  %v593_v22 = vld [vmem:[%s802_s1 + $0xac] ss:$16 sps:$4 sm:$0xff]   ;;  %v595_v23 = vld [vmem:[%s802_s1 + $0xa0] ss:$16 sps:$4 sm:$0xff]   ;;  %v596_v24 = vld [vmem:[%s802_s1 + $0xa8] ss:$16 sps:$4 sm:$0xff]  }
   0x9   :  { %v597_v25 = vld [vmem:[%s802_s1 + $0xc4] ss:$16 sps:$4 sm:$0xff]   ;;  %v599_v26 = vld [vmem:[%s802_s1 + $0xcc] ss:$16 sps:$4 sm:$0xff]   ;;  %v601_v27 = vld [vmem:[%s802_s1 + $0xc0] ss:$16 sps:$4 sm:$0xff]  }
   0xa   :  { %v602_v28 = vld [vmem:[%s802_s1 + $0xc8] ss:$16 sps:$4 sm:$0xff]   ;;  %v603_v29 = vld [vmem:[%s802_s1 + $0xe4] ss:$16 sps:$4 sm:$0xff]   ;;  %v605_v30 = vld [vmem:[%s802_s1 + $0xec] ss:$16 sps:$4 sm:$0xff]  }
   0xb   :  { %289 = vmatpush1.bf16.msra.mxu0 %v577_v11  ;;  %342 = vmatpush1.bf16.msra.mxu1 %v578_v12  ;;  %v617_v31 = vld [vmem:[%s803_s0 + $0x4] ss:$8 sps:$4 sm:$0xff]   ;;  %v57_v33 = vld [vmem:[%s804_s2 + $0x10] sm:$0xff]  ;;  %v608_v35 = vld [vmem:[%s802_s1 + $0xe8] ss:$16 sps:$4 sm:$0xff]  }
   0xc   :  { %290 = vmatprep.subr.bf16.mxu0 %v579_v13  ;;  %343 = vmatprep.subr.bf16.mxu1 %v581_v14  ;;  %v55_v32 = vld [vmem:[%s804_s2] sm:$0xff]  ;;  %v611_v37 = vld [vmem:[%s802_s1 + $0x10c] ss:$16 sps:$4 sm:$0xff]   ;;  %v614_v41 = vld [vmem:[%s802_s1 + $0x108] ss:$16 sps:$4 sm:$0xff]  }
   0xd   :  { %538 = vmatprep.mubr.msk.bf16.mxu0 %vm277_vm0, %v617_v31  ;;  %540 = vmatprep.mubr.msk.bf16.mxu1 %vm277_vm0, %v617_v31  ;;  %v607_v34 = vld [vmem:[%s802_s1 + $0xe0] ss:$16 sps:$4 sm:$0xff]   ;;  %v609_v36 = vld [vmem:[%s802_s1 + $0x104] ss:$16 sps:$4 sm:$0xff]   ;;  %v56_v38 = vld [vmem:[%s804_s2 + $0x8] sm:$0xff] }
   0xe   :  { %61 = vperm.xlu0 %559, %v55_v32   ;;  %71 = vperm.xlu1 %560, %v57_v33   ;;  %v58_v39 = vld [vmem:[%s804_s2 + $0x18] sm:$0xff]  ;;  %v613_v40 = vld [vmem:[%s802_s1 + $0x100] ss:$16 sps:$4 sm:$0xff]  }
   0xf   :  { %291 = vmatpush1.bf16.msra.mxu0 %v583_v15  ;;  %344 = vmatpush1.bf16.msra.mxu1 %v584_v16  ;;  %v615_v42 = vld [vmem:[%s803_s0] ss:$8 sps:$4 sm:$0xff]   ;;  %v618_v43 = vld [vmem:[%s803_s0 + $0x14] ss:$8 sps:$4 sm:$0xff]   ;;  %v620_v44 = vld [vmem:[%s803_s0 + $0x10] ss:$8 sps:$4 sm:$0xff]  }
  0x10   :  { %292 = vmatprep.subr.bf16.mxu0 %v585_v17  ;;  %345 = vmatprep.subr.bf16.mxu1 %v587_v18 }
  0x12   :  { %66 = vperm.xlu0 %559, %v56_v38   ;;  %76 = vperm.xlu1 %560, %v58_v39  }
  0x13   :  { %293 = vmatpush1.bf16.msra.mxu0 %v589_v19  ;;  %346 = vmatpush1.bf16.msra.mxu1 %v590_v20 }
  0x14   :  { %294 = vmatprep.subr.bf16.mxu0 %v591_v21  ;;  %347 = vmatprep.subr.bf16.mxu1 %v593_v22 }
  0x17   :  { %295 = vmatpush1.bf16.msra.mxu0 %v595_v23  ;;  %348 = vmatpush1.bf16.msra.mxu1 %v596_v24 }
  0x18   :  { %296 = vmatprep.subr.bf16.mxu0 %v597_v25  ;;  %349 = vmatprep.subr.bf16.mxu1 %v599_v26 }
  0x1b   :  { %297 = vmatpush1.bf16.msra.mxu0 %v601_v27  ;;  %350 = vmatpush1.bf16.msra.mxu1 %v602_v28 }
  0x1c   :  { %298 = vmatprep.subr.bf16.mxu0 %v603_v29  ;;  %351 = vmatprep.subr.bf16.mxu1 %v605_v30 }
  0x1f   :  { %299 = vmatpush1.bf16.msra.mxu0 %v607_v34  ;;  %352 = vmatpush1.bf16.msra.mxu1 %v608_v35 }
  0x20   :  { %300 = vmatprep.subr.bf16.mxu0 %v609_v36  ;;  %353 = vmatprep.subr.bf16.mxu1 %v611_v37 }
  0x23   :  { %301 = vmatpush1.bf16.msra.mxu0 %v613_v40  ;;  %354 = vmatpush1.bf16.msra.mxu1 %v614_v41 }
  0x26   :  { %317 = vmatmul.mubr.bf16.vlgmr.msra.gmra.mrb[0].mxu0 %v615_v42  ;;  %370 = vmatmul.mubr.bf16.vlgmr.msra.gmra.mrb[0].mxu1 %v615_v42 }
  0x27   :  { %539 = vmatprep.mubr.msk.bf16.mxu0 %vm277_vm0, %v618_v43  ;;  %541 = vmatprep.mubr.msk.bf16.mxu1 %vm277_vm0, %v618_v43 }
  0x2e   :  { %327 = vmatmul.mubr.bf16.gmra.mrb[4].mxu0 %v620_v44  ;;  %380 = vmatmul.mubr.bf16.gmra.mrb[4].mxu1 %v620_v44 }
  0x8d   :  { %v62_v45 = vpop.permute.xlu0 %61  ;;  %v72_v10 = vpop.permute.xlu1 %71 }
  0x91   :  { %v67_v46 = vpop.permute.xlu0 %66  ;;  %v77_v33 = vpop.permute.xlu1 %76 }
  0xf9   :  { %v318_v47 = vpop.f32.mrb[0].mxu0  ;;  %v371_v48 = vpop.f32.mrb[0].mxu1 }
  0xfa   :  { %v319_v49 = vadd.f32 %v318_v47, %v62_v45  ;;  %v372_v50 = vadd.f32 %v371_v48, %v62_v45  ;;  %v320_v51 = vpop.f32.mrb[1].mxu0  ;;  %v373_v52 = vpop.f32.mrb[1].mxu1 }
  0xfb   :  { %v321_v53 = vadd.f32 %v320_v51, %v62_v45  ;;  %v374_v54 = vadd.f32 %v373_v52, %v62_v45  ;;  %v322_v55 = vpop.f32.mrb[2].mxu0  ;;  %v375_v56 = vpop.f32.mrb[2].mxu1 }
  0xfc   :  { %vm390_vm1 = vcmp.ge.f32.partialorder %v319_v49, 0.0  ;;  %v406_v57 = vmul.f32 0.01, %v319_v49  ;;  %vm392_vm2 = vcmp.ge.f32.partialorder %v372_v50, 0.0  ;;  %v408_v58 = vmul.f32 0.01, %v372_v50 }
  0xfd   :  { %vm391_vm3 = vcmp.ge.f32.partialorder %v321_v53, 0.0  ;;  %v407_v59 = vmul.f32 0.01, %v321_v53  ;;  %vm393_vm4 = vcmp.ge.f32.partialorder %v374_v54, 0.0  ;;  %v409_v60 = vmul.f32 0.01, %v374_v54 }
  0xfe   :  { %v422_v61 = vsel %vm390_vm1, %v319_v49, %v406_v57  ;;  %v424_v62 = vsel %vm392_vm2, %v372_v50, %v408_v58  ;;  %v323_v63 = vadd.f32 %v322_v55, %v67_v46  ;;  %v376_v0 = vadd.f32 %v375_v56, %v67_v46  ;;  %v324_v1 = vpop.f32.mrb[3].mxu0  ;;  %v377_v2 = vpop.f32.mrb[3].mxu1 }
  0xff   :  { %v423_v3 = vsel %vm391_vm3, %v321_v53, %v407_v59  ;;  %v425_v4 = vsel %vm393_vm4, %v374_v54, %v409_v60  ;;  %v325_v5 = vadd.f32 %v324_v1, %v67_v46  ;;  %v378_v6 = vadd.f32 %v377_v2, %v67_v46 }
 0x100   :  { %v550_v7 = vpack.c.bf16 %v423_v3, %v422_v61  ;;  %v551_v8 = vpack.c.bf16 %v425_v4, %v424_v62  ;;  %vm394_vm5 = vcmp.ge.f32.partialorder %v323_v63, 0.0  ;;  %v410_v9 = vmul.f32 0.01, %v323_v63 }
 0x101   :  { %vm396_vm6 = vcmp.ge.f32.partialorder %v376_v0, 0.0  ;;  %v412_v11 = vmul.f32 0.01, %v376_v0  ;;  %vm395_vm7 = vcmp.ge.f32.partialorder %v325_v5, 0.0  ;;  %v411_v12 = vmul.f32 0.01, %v325_v5 }
 0x102   :  { %486 = vst [vmem:[%s805_s3] sm:$0xff] %v550_v7  ;;  %487 = vst [vmem:[%s805_s3 + $0x8] sm:$0xff] %v551_v8  ;;  %v426_v13 = vsel %vm394_vm5, %v323_v63, %v410_v9  ;;  %vm397_vm8 = vcmp.ge.f32.partialorder %v378_v6, 0.0  ;;  %v413_v14 = vmul.f32 0.01, %v378_v6  ;;  %v328_v15 = vpop.f32.mrb[4].mxu0  ;;  %v381_v16 = vpop.f32.mrb[4].mxu1 }
 0x103   :  { %v428_v17 = vsel %vm396_vm6, %v376_v0, %v412_v11  ;;  %v427_v18 = vsel %vm395_vm7, %v325_v5, %v411_v12  ;;  %v329_v19 = vadd.f32 %v328_v15, %v72_v10  ;;  %v382_v20 = vadd.f32 %v381_v16, %v72_v10  ;;  %v330_v21 = vpop.f32.mrb[5].mxu0  ;;  %v383_v22 = vpop.f32.mrb[5].mxu1 }
 0x104   :  { %v552_v23 = vpack.c.bf16 %v427_v18, %v426_v13  ;;  %v429_v24 = vsel %vm397_vm8, %v378_v6, %v413_v14  ;;  %v331_v25 = vadd.f32 %v330_v21, %v72_v10  ;;  %v384_v26 = vadd.f32 %v383_v22, %v72_v10  ;;  %v332_v27 = vpop.f32.mrb[6].mxu0  ;;  %v385_v28 = vpop.f32.mrb[6].mxu1 }
 0x105   :  { %v553_v29 = vpack.c.bf16 %v429_v24, %v428_v17  ;;  %vm398_vm9 = vcmp.ge.f32.partialorder %v329_v19, 0.0  ;;  %v414_v30 = vmul.f32 0.01, %v329_v19  ;;  %vm400_vm10 = vcmp.ge.f32.partialorder %v382_v20, 0.0  ;;  %v334_v31 = vpop.f32.mrb[7].mxu0  ;;  %v387_v32 = vpop.f32.mrb[7].mxu1 }
 0x106   :  { %488 = vst [vmem:[%s805_s3 + $0x10] sm:$0xff] %v552_v23  ;;  %v416_v34 = vmul.f32 0.01, %v382_v20  ;;  %vm399_vm11 = vcmp.ge.f32.partialorder %v331_v25, 0.0  ;;  %v415_v35 = vmul.f32 0.01, %v331_v25  ;;  %v333_v38 = vadd.f32 %v332_v27, %v77_v33 }
 0x107   :  { %vm401_vm12 = vcmp.ge.f32.partialorder %v384_v26, 0.0  ;;  %489 = vst [vmem:[%s805_s3 + $0x18] sm:$0xff] %v553_v29  ;;  %v430_v36 = vsel %vm398_vm9, %v329_v19, %v414_v30  ;;  %v417_v37 = vmul.f32 0.01, %v384_v26  ;;  %v386_v39 = vadd.f32 %v385_v28, %v77_v33 }
 0x108   :  { %v432_v40 = vsel %vm400_vm10, %v382_v20, %v416_v34  ;;  %v431_v41 = vsel %vm399_vm11, %v331_v25, %v415_v35  ;;  %v335_v42 = vadd.f32 %v334_v31, %v77_v33  ;;  %v388_v43 = vadd.f32 %v387_v32, %v77_v33 }
 0x109   :  { %v554_v44 = vpack.c.bf16 %v431_v41, %v430_v36  ;;  %v433_v45 = vsel %vm401_vm12, %v384_v26, %v417_v37  ;;  %vm402_vm13 = vcmp.ge.f32.partialorder %v333_v38, 0.0  ;;  %v418_v46 = vmul.f32 0.01, %v333_v38 }
 0x10a   :  { %v555_v47 = vpack.c.bf16 %v433_v45, %v432_v40  ;;  %vm404_vm14 = vcmp.ge.f32.partialorder %v386_v39, 0.0  ;;  %v420_v48 = vmul.f32 0.01, %v386_v39  ;;  %vm403_vm15 = vcmp.ge.f32.partialorder %v335_v42, 0.0 }
 0x10b   :  { %490 = vst [vmem:[%s805_s3 + $0x20] sm:$0xff] %v554_v44  ;;  %v434_v49 = vsel %vm402_vm13, %v333_v38, %v418_v46  ;;  %v419_v50 = vmul.f32 0.01, %v335_v42  ;;  %vm405_vm0 = vcmp.ge.f32.partialorder %v388_v43, 0.0  ;;  %v421_v51 = vmul.f32 0.01, %v388_v43 }
 0x10c   :  { %491 = vst [vmem:[%s805_s3 + $0x28] sm:$0xff] %v555_v47  ;;  %v436_v52 = vsel %vm404_vm14, %v386_v39, %v420_v48 }
 0x10d   :  { %v435_v53 = vsel %vm403_vm15, %v335_v42, %v419_v50  ;;  %v437_v54 = vsel %vm405_vm0, %v388_v43, %v421_v51 }
 0x10e   :  { %v556_v55 = vpack.c.bf16 %v435_v53, %v434_v49  ;;  %v557_v56 = vpack.c.bf16 %v437_v54, %v436_v52 }
 0x110   :  { %492 = vst [vmem:[%s805_s3 + $0x30] sm:$0xff] %v556_v55  ;;  %493 = vst [vmem:[%s805_s3 + $0x38] sm:$0xff] %v557_v56 }

// kernel: decoder_forward.7
= control target key start
LH: loop header
LB: loop body
LE: loop exit
PB: predicated region body
PF: predicated region fallthrough
CT: control target
= control target key end

     0   :  { %s787_s12 = smov 0   ;;  %s789_s13 = smov 0   ;;  %s918_s0 = inlined_call_operand.vmem [shape: bf16[12,72], index: 0, kind: input, shape index: {}]   ;;  %s919_s1 = inlined_call_operand.vmem [shape: bf16[72,2048], index: 1, kind: input, shape index: {}]   ;;  %s920_s2 = inlined_call_operand.vmem [shape: f32[12,1], index: 2, kind: input, shape index: {}]   ;;  %s921_s3 = inlined_call_operand.vmem [shape: f32[12,2048], index: 3, kind: output, shape index: {}]  }
   0x1   :  { %s791_s14 = smov 0  }
   0x2 LB: > { %s605_s15 = sadd.s32 4294967295, %s764_s14   ;;  %s804_s16 = sadd.s32 1, %s764_s14   ;;  %s764_s14 = sphi %s791_s14, %s925_s14   ;;  %s760_s13 = sphi %s789_s13, %s924_s13   ;;  %s756_s12 = sphi %s787_s12, %s923_s12  }
   0x3   : > { %s38_s17 = ssub.s32 %s764_s14, %s804_s16  ;;  %s41_s18 = sadd.s32 1, %s760_s13 }
   0x4   : > { %p39_p0 = scmp.eq.s32.totalorder %s38_s17, 0  ;;  %p48_p1 = scmp.ne.s32.totalorder %s760_s13, %s756_s12 }
   0x5   : > { %p49_p2 = scmp.eq.s32.totalorder %s764_s14, 0  ;;  %p99_p3 = scmp.eq.s32.totalorder %s605_s15, 3 }
   0x6   : > { %s815_s19 = scalar_select %p39_p0, %s760_s13, %s41_s18  }
   0x7   : > { %p50_p4 = por %p49_p2, %p48_p1  ;;  %p817_p5 = por %p99_p3, %p48_p1 }
   0x8   : > { %p608_p6 = scmp.ge.s32.totalorder %s764_s14, 4 }
   0xa   : > { %127 = sbr.rel (%p608_p6) target bundleno = 30 (0x1e), region = 24 }
  0x11   : > { %130 = sbr.rel (!%p50_p4) target bundleno = 30 (0x1e), region = 28  ;;  %s132_s21 = sand.u32 (%p50_p4), 1, %s760_s13  }
  0x12   : > { %s651_s22 = sshll.u32 (%p50_p4), %s764_s14, 4  ;;  %s653_s23 = smul.u32 (%p50_p4), 144, %s132_s21 }
  0x13   : > { %s827_s26 = scalar_lea.vmem (%p50_p4), %s919_s1, %s651_s22 }
  0x14   : > { %v150_v0 = vld [vmem:[%s827_s26] sm:$0xff] (%p50_p4)  ;;  %v152_v1 = vld [vmem:[%s827_s26 + $0x8] sm:$0xff] (%p50_p4)  ;;  %s134_s27 = scalar_lea.vmem (%p50_p4), [#allocation2], %s653_s23 }
  0x15   : > { %v154_v2 = vld [vmem:[%s827_s26 + $0x40] sm:$0xff] (%p50_p4)  ;;  %v156_v3 = vld [vmem:[%s827_s26 + $0x48] sm:$0xff] (%p50_p4)  ;;  %151 = vst [vmem:[%s134_s27] sm:$0xff] (%p50_p4), %v150_v0  ;;  %153 = vst [vmem:[%s134_s27 + $0x8] sm:$0xff] (%p50_p4), %v152_v1 }
  0x16   : > { %v158_v4 = vld [vmem:[%s827_s26 + $0x80] sm:$0xff] (%p50_p4)  ;;  %v160_v5 = vld [vmem:[%s827_s26 + $0x88] sm:$0xff] (%p50_p4)  ;;  %155 = vst [vmem:[%s134_s27 + $0x10] sm:$0xff] (%p50_p4), %v154_v2  ;;  %157 = vst [vmem:[%s134_s27 + $0x18] sm:$0xff] (%p50_p4), %v156_v3 }
  0x17   : > { %159 = vst [vmem:[%s134_s27 + $0x20] sm:$0xff] (%p50_p4), %v158_v4  ;;  %161 = vst [vmem:[%s134_s27 + $0x28] sm:$0xff] (%p50_p4), %v160_v5  ;;  %v162_v6 = vld [vmem:[%s827_s26 + $0xc0] sm:$0xff] (%p50_p4)  ;;  %v164_v7 = vld [vmem:[%s827_s26 + $0xc8] sm:$0xff] (%p50_p4) }
  0x18   : > { %v166_v8 = vld [vmem:[%s827_s26 + $0x100] sm:$0xff]  ;;  %163 = vst [vmem:[%s134_s27 + $0x30] sm:$0xff] %v162_v6  ;;  %165 = vst [vmem:[%s134_s27 + $0x38] sm:$0xff] %v164_v7  ;;  %v168_v9 = vld [vmem:[%s827_s26 + $0x108] sm:$0xff] }
  0x19   : > { %167 = vst [vmem:[%s134_s27 + $0x40] sm:$0xff] %v166_v8  ;;  %v170_v10 = vld [vmem:[%s827_s26 + $0x140] sm:$0xff]  ;;  %v172_v11 = vld [vmem:[%s827_s26 + $0x148] sm:$0xff]  ;;  %169 = vst [vmem:[%s134_s27 + $0x48] sm:$0xff] %v168_v9 }
  0x1a   : > { %171 = vst [vmem:[%s134_s27 + $0x50] sm:$0xff] %v170_v10  ;;  %173 = vst [vmem:[%s134_s27 + $0x58] sm:$0xff] %v172_v11  ;;  %v174_v12 = vld [vmem:[%s827_s26 + $0x180] sm:$0xff]  ;;  %v176_v13 = vld [vmem:[%s827_s26 + $0x188] sm:$0xff] }
  0x1b   : > { %v178_v14 = vld [vmem:[%s827_s26 + $0x1c0] sm:$0xff]  ;;  %175 = vst [vmem:[%s134_s27 + $0x60] sm:$0xff] %v174_v12  ;;  %177 = vst [vmem:[%s134_s27 + $0x68] sm:$0xff] %v176_v13  ;;  %v180_v15 = vld [vmem:[%s827_s26 + $0x1c8] sm:$0xff] }
  0x1c   : > { %179 = vst [vmem:[%s134_s27 + $0x70] sm:$0xff] %v178_v14  ;;  %v182_v16 = vld [vmem:[%s827_s26 + $0x200] sm:$0xff]  ;;  %v184_v17 = vld [vmem:[%s827_s26 + $0x208] sm:$0xff]  ;;  %181 = vst [vmem:[%s134_s27 + $0x78] sm:$0xff] %v180_v15 }
  0x1d   : > { %183 = vst [vmem:[%s134_s27 + $0x80] sm:$0xff] %v182_v16  ;;  %185 = vst [vmem:[%s134_s27 + $0x88] sm:$0xff] %v184_v17 }
  0x1e PF: > { %p611_p7 = scmp.ge.s32.totalorder %s764_s14, 1  ;;  %p190_p8 = scmp.lt.s32.totalorder %s764_s14, 5 }
  0x20   : > { %p191_p9 = pnand %p611_p7, %p190_p8 }
  0x21   : > { %s197_s28 = sand.u32 (!%p191_p9), 1, %s756_s12   ;;  %v766_v18 = vmov (!%p191_p9), 0   ;;  %v242_v19 = vld [vmem:[%s920_s2] sm:$0xff] (!%p191_p9)  ;;  %v243_v20 = vld [vmem:[%s920_s2 + $0x8] sm:$0xf] (!%p191_p9)  ;;  %vm353_vm0 = vcmask (!%p191_p9), 1043456  }
  0x22   : > { %194 = sbr.rel (%p191_p9) target bundleno = 315 (0x13b), region = 51  ;;  %398 = vmatprep.mubr.bf16.mxu0 (!%p191_p9), %v766_v18  ;;  %441 = vmatprep.mubr.bf16.mxu1 (!%p191_p9), %v766_v18  ;;  %v709_v45 = vld [vmem:[%s918_s0] sm:$0x3f] (!%p191_p9)   ;;  %vm349_vm1 = vcmask (!%p191_p9), 588800   ;;  %s612_s10 = sshll.u32 (!%p191_p9), %s197_s28, 6 }
  0x23   : > { %s654_s29 = smul.u32 (!%p191_p9), 144, %s197_s28  ;;  %680 = vset.pattern.permute.xlu0 (!%p191_p9), %v766_v18  ;;  %s883_s11 = scalar_lea.vmem (!%p191_p9), [#allocation3], %s612_s10 }
  0x24   : > { %246 = vperm.xlu0 (!%p191_p9), %680, %v242_v19  }
  0x25   : > { %s858_s7 = scalar_lea.vmem (!%p191_p9), [#allocation2], %s654_s29 }
  0x26   : > { %v681_v21 = vld [vmem:[%s858_s7 + $0x4] ss:$16 sps:$4 sm:$0xff] (!%p191_p9)   ;;  %v683_v22 = vld [vmem:[%s858_s7 + $0xc] ss:$16 sps:$4 sm:$0xff] (!%p191_p9)   ;;  %v685_v23 = vld [vmem:[%s858_s7] ss:$16 sps:$4 sm:$0xff] (!%p191_p9)  }
  0x27   : > { %366 = vmatprep.subr.bf16.mxu0 (!%p191_p9), %v681_v21  ;;  %v686_v24 = vld [vmem:[%s858_s7 + $0x8] ss:$16 sps:$4 sm:$0xff] (!%p191_p9)   ;;  %409 = vmatprep.subr.bf16.mxu1 (!%p191_p9), %v683_v22  ;;  %v687_v25 = vld [vmem:[%s858_s7 + $0x24] ss:$16 sps:$4 sm:$0xff] (!%p191_p9)   ;;  %v689_v26 = vld [vmem:[%s858_s7 + $0x2c] ss:$16 sps:$4 sm:$0xff] (!%p191_p9)  }
  0x28   : > { %251 = vperm.xlu0 (!%p191_p9), %680, %v243_v20   ;;  %367 = vmatpush1.bf16.msra.mxu0 (!%p191_p9), %v685_v23  ;;  %v691_v27 = vld [vmem:[%s858_s7 + $0x20] ss:$16 sps:$4 sm:$0xff] (!%p191_p9)   ;;  %v692_v28 = vld [vmem:[%s858_s7 + $0x28] ss:$16 sps:$4 sm:$0xff] (!%p191_p9)   ;;  %v693_v29 = vld [vmem:[%s858_s7 + $0x44] ss:$16 sps:$4 sm:$0xff] (!%p191_p9)  }
  0x29   : > { %410 = vmatpush1.bf16.msra.mxu1 %v686_v24  ;;  %368 = vmatprep.subr.bf16.mxu0 %v687_v25  ;;  %v695_v30 = vld [vmem:[%s858_s7 + $0x4c] ss:$16 sps:$4 sm:$0xff]   ;;  %v697_v31 = vld [vmem:[%s858_s7 + $0x40] ss:$16 sps:$4 sm:$0xff]   ;;  %v698_v32 = vld [vmem:[%s858_s7 + $0x48] ss:$16 sps:$4 sm:$0xff]  }
  0x2a   : > { %411 = vmatprep.subr.bf16.mxu1 %v689_v26  ;;  %v699_v33 = vld [vmem:[%s858_s7 + $0x64] ss:$16 sps:$4 sm:$0xff]   ;;  %v701_v34 = vld [vmem:[%s858_s7 + $0x6c] ss:$16 sps:$4 sm:$0xff]   ;;  %v703_v37 = vld [vmem:[%s858_s7 + $0x60] ss:$16 sps:$4 sm:$0xff]  }
  0x2b   : > { %v240_v35 = vld [vmem:[%s858_s7 + $0x80] sm:$0xff]  ;;  %v241_v36 = vld [vmem:[%s858_s7 + $0x88] sm:$0xff]  ;;  %s652_s12 = sshll.u32 (%p817_p5), %s605_s15, 5 }
  0x2c   : > { %369 = vmatpush1.bf16.msra.mxu0 %v691_v27  ;;  %v704_v38 = vld [vmem:[%s858_s7 + $0x68] ss:$16 sps:$4 sm:$0xff]   ;;  %v631_v39 = vcombine.high %v240_v35, %v240_v35  ;;  %v633_v40 = vcombine.high %v241_v36, %v241_v36  ;;  %v630_v41 = vcombine.low %v240_v35, %v240_v35  ;;  %v632_v42 = vcombine.low %v241_v36, %v241_v36  ;;  %s517_s21 = scalar_lea.vmem (%p817_p5), %s921_s3, %s652_s12 }
  0x2d   : > { %412 = vmatpush1.bf16.msra.mxu1 %v692_v28  ;;  %370 = vmatprep.subr.bf16.mxu0 %v693_v29 }
  0x2e   : > { %413 = vmatprep.subr.bf16.mxu1 %v695_v30  ;;  %v355_v43 = vsel %vm353_vm0, %v630_v41, 0  ;;  %v361_v44 = vsel %vm353_vm0, %v632_v42, 0 }
  0x30   : > { %371 = vmatpush1.bf16.msra.mxu0 %v697_v31 }
  0x31   : > { %414 = vmatpush1.bf16.msra.mxu1 %v698_v32  ;;  %372 = vmatprep.subr.bf16.mxu0 %v699_v33 }
  0x32   : > { %415 = vmatprep.subr.bf16.mxu1 %v701_v34 }
  0x34   : > { %373 = vmatpush1.bf16.msra.mxu0 %v703_v37 }
  0x35   : > { %416 = vmatpush1.bf16.msra.mxu1 %v704_v38  ;;  %634 = vmatprep.subr.msk.bf16.mxu0 %vm353_vm0, %v631_v39 }
  0x36   : > { %636 = vmatprep.subr.msk.bf16.mxu1 %vm353_vm0, %v633_v40 }
  0x38   : > { %375 = vmatpush1.bf16.msra.mxu0 %v355_v43 }
  0x39   : > { %418 = vmatpush1.bf16.msra.mxu1 %v361_v44 }
  0x3b   : > { %635 = vmatmul.mubr.msk.bf16.vlgmr.msra.gmra.mrb[0].mxu0 %vm349_vm1, %v709_v45 }
  0x3c   : > { %637 = vmatmul.mubr.msk.bf16.vlgmr.msra.gmra.mrb[0].mxu1 %vm349_vm1, %v709_v45 }
  0xa3   : > { %v247_v46 = vpop.permute.xlu0 %246 }
  0xa7   : > { %v252_v47 = vpop.permute.xlu0 %251 }
 0x10e   : > { %v400_v48 = vpop.f32.mrb[0].mxu0 }
 0x10f   : > { %v443_v49 = vpop.f32.mrb[0].mxu1  ;;  %v401_v50 = vadd.f32 %v400_v48, %v247_v46  ;;  %v402_v52 = vpop.f32.mrb[1].mxu0 }
 0x110   : > { %v444_v51 = vadd.f32 %v443_v49, %v247_v46  ;;  %v445_v53 = vpop.f32.mrb[1].mxu1  ;;  %v403_v54 = vadd.f32 %v402_v52, %v247_v46  ;;  %v404_v56 = vpop.f32.mrb[2].mxu0 }
 0x111   : > { %v446_v55 = vadd.f32 %v445_v53, %v247_v46  ;;  %v447_v57 = vpop.f32.mrb[2].mxu1  ;;  %v638_v58 = vmul.f32 -1.442695, %v401_v50  ;;  %v405_v60 = vadd.f32 %v404_v56, %v252_v47  ;;  %v406_v62 = vpop.f32.mrb[3].mxu0 }
 0x112   : > { %v640_v59 = vmul.f32 -1.442695, %v444_v51  ;;  %v448_v61 = vadd.f32 %v447_v57, %v252_v47  ;;  %v449_v63 = vpop.f32.mrb[3].mxu1  ;;  %v639_v0 = vmul.f32 -1.442695, %v403_v54  ;;  %v407_v2 = vadd.f32 %v406_v62, %v252_v47 }
 0x113   : > { %v641_v1 = vmul.f32 -1.442695, %v446_v55  ;;  %v450_v3 = vadd.f32 %v449_v63, %v252_v47  ;;  %710 = vpow2.f32 %v638_v58  ;;  %v642_v4 = vmul.f32 -1.442695, %v405_v60 }
 0x114   : > { %712 = vpow2.f32 %v640_v59  ;;  %v644_v5 = vmul.f32 -1.442695, %v448_v61  ;;  %v643_v6 = vmul.f32 -1.442695, %v407_v2 }
 0x115   : > { %714 = vpow2.f32 %v639_v0  ;;  %v645_v7 = vmul.f32 -1.442695, %v450_v3 }
 0x116   : > { %716 = vpow2.f32 %v641_v1 }
 0x117   : > { %718 = vpow2.f32 %v642_v4 }
 0x118   : > { %720 = vpow2.f32 %v644_v5 }
 0x119   : > { %722 = vpow2.f32 %v643_v6 }
 0x11a   : > { %724 = vpow2.f32 %v645_v7 }
 0x11d   : > { %v711_v8 = vpop.eup %710 }
 0x11e   : > { %v713_v9 = vpop.eup %712  ;;  %v476_v10 = vadd.f32 1.0, %v711_v8 }
 0x11f   : > { %v715_v11 = vpop.eup %714  ;;  %v478_v12 = vadd.f32 1.0, %v713_v9 }
 0x120   : > { %v717_v13 = vpop.eup %716  ;;  %726 = vrcp.f32 %v476_v10  ;;  %v477_v14 = vadd.f32 1.0, %v715_v11 }
 0x121   : > { %v719_v15 = vpop.eup %718  ;;  %728 = vrcp.f32 %v478_v12  ;;  %v479_v16 = vadd.f32 1.0, %v717_v13 }
 0x122   : > { %v721_v17 = vpop.eup %720  ;;  %730 = vrcp.f32 %v477_v14  ;;  %v480_v18 = vadd.f32 1.0, %v719_v15 }
 0x123   : > { %v723_v19 = vpop.eup %722  ;;  %732 = vrcp.f32 %v479_v16  ;;  %v482_v20 = vadd.f32 1.0, %v721_v17 }
 0x124   : > { %v725_v21 = vpop.eup %724  ;;  %734 = vrcp.f32 %v480_v18  ;;  %v481_v22 = vadd.f32 1.0, %v723_v19 }
 0x125   : > { %736 = vrcp.f32 %v482_v20  ;;  %v483_v23 = vadd.f32 1.0, %v725_v21 }
 0x126   : > { %738 = vrcp.f32 %v481_v22 }
 0x127   : > { %740 = vrcp.f32 %v483_v23 }
 0x12a   : > { %v727_v24 = vpop.eup %726 }
 0x12b   : > { %v729_v25 = vpop.eup %728  ;;  %500 = vst [vmem:[%s883_s11] sm:$0xff] %v727_v24 }
 0x12c   : > { %v731_v26 = vpop.eup %730  ;;  %502 = vst [vmem:[%s883_s11 + $0x10] sm:$0xff] %v729_v25  ;;  %514 = sbr.rel (!%p817_p5) target bundleno = 315 (0x13b), region = 59 }
 0x12d   : > { %v733_v27 = vpop.eup %732  ;;  %501 = vst [vmem:[%s883_s11 + $0x8] sm:$0xff] %v731_v26 }
 0x12e   : > { %v735_v28 = vpop.eup %734  ;;  %503 = vst [vmem:[%s883_s11 + $0x18] sm:$0xff] %v733_v27 }
 0x12f   : > { %v737_v29 = vpop.eup %736  ;;  %504 = vst [vmem:[%s883_s11 + $0x20] sm:$0xf] %v735_v28 }
 0x130   : > { %v739_v30 = vpop.eup %738  ;;  %506 = vst [vmem:[%s883_s11 + $0x30] sm:$0xf] %v737_v29 }
 0x131   : > { %v741_v31 = vpop.eup %740  ;;  %505 = vst [vmem:[%s883_s11 + $0x28] sm:$0xf] %v739_v30 }
 0x132   : > { %507 = vst [vmem:[%s883_s11 + $0x38] sm:$0xf] %v741_v31  ;;  %v530_v32 = vld [vmem:[%s883_s11] sm:$0xff] (%p817_p5) }
 0x133   : > { %v534_v34 = vld [vmem:[%s883_s11 + $0x10] sm:$0xff]  ;;  %531 = vst [vmem:[%s517_s21] sm:$0xff] %v530_v32 }
 0x134   : > { %v532_v33 = vld [vmem:[%s883_s11 + $0x8] sm:$0xff]  ;;  %535 = vst [vmem:[%s517_s21 + $0x10] sm:$0xff] %v534_v34 }
 0x135   : > { %v536_v35 = vld [vmem:[%s883_s11 + $0x18] sm:$0xff]  ;;  %533 = vst [vmem:[%s517_s21 + $0x8] sm:$0xff] %v532_v33 }
 0x136   : > { %v538_v36 = vld [vmem:[%s883_s11 + $0x20] sm:$0xff]  ;;  %537 = vst [vmem:[%s517_s21 + $0x18] sm:$0xff] %v536_v35 }
 0x137   : > { %539 = vst [vmem:[%s517_s21 + $0x80] sm:$0xff] %v538_v36  ;;  %v542_v38 = vld [vmem:[%s883_s11 + $0x30] sm:$0xff] }
 0x138   : > { %v540_v37 = vld [vmem:[%s883_s11 + $0x28] sm:$0xff]  ;;  %543 = vst [vmem:[%s517_s21 + $0x90] sm:$0xff] %v542_v38 }
 0x139   : > { %541 = vst [vmem:[%s517_s21 + $0x88] sm:$0xff] %v540_v37  ;;  %v544_v39 = vld [vmem:[%s883_s11 + $0x38] sm:$0xff] }
 0x13a   : > { %545 = vst [vmem:[%s517_s21 + $0x98] sm:$0xff] %v544_v39 }
 0x13b PF: > { %p10_p10 = scmp.ge.s32.totalorder %s804_s16, 6   ;;  %s923_s12 = smov %s760_s13 }
 0x13c   : > { %s924_s13 = smov %s815_s19  ;;  %s925_s14 = smov %s804_s16 }
 0x13d   :  { %12 = sbr.rel (!%p10_p10) target bundleno = 2 (0x2), region = 113 }

</bundles_post_ra>
